<compile_context>
chip_gen: v6e
topology: v6e:2x2x1
jax: 0.10.0
libtpu: 0.0.40
codegen_flags: <defaults>
</compile_context>

<pallas_src>
import numpy as np
import jax
import jax.numpy as jnp
from jax.experimental import pallas as pl
from jax.experimental.pallas import tpu as pltpu

BN_EPS = 1e-5
NUM_LAYERS = 5
# MXU operand dtype (accumulation is always f32). Set to jnp.float32 for bit-tight accuracy.
COMPUTE_DTYPE = jnp.bfloat16


# ------------------------------ fused kernel -------------------------------

def _gbblock_fused_kernel(*refs):
    """One batch element end-to-end: conv4x4/s2 -> 4x (maxpool2x2 + conv1x1), BN+ReLU fused.

    Activation layout throughout: rows = image row h (sublanes), lanes = (w, c)
    flattened (lane-dense). Pooling uses constant 0/1 selection matmuls (MXU)
    plus elementwise max (VPU); the 1x1 conv is a block-diagonal matmul whose
    output is already in the next layer's layout, so nothing ever leaves VMEM
    until the per-layer output store.
    """
    ins, outs = refs[:-NUM_LAYERS], refs[-NUM_LAYERS:]
    assert len(ins) == 3 + 6 * (NUM_LAYERS - 1)
    patch_ref, w1_ref, b1_ref = ins[0], ins[1], ins[2]

    # ---- layer 1: Conv2d(4, stride 2, pad 1) as one banded matmul (BN scale folded) ----
    acc = jnp.dot(patch_ref[0], w1_ref[...], preferred_element_type=jnp.float32)
    act = jnp.maximum(acc + b1_ref[...], 0.0)                  # (H1, W1*C1) f32
    outs[0][0] = act

    # ---- layers 2..5: MaxPool(2,2) + Conv2d(1x1) + BN + ReLU ----
    for li in range(NUM_LAYERS - 1):
        se_ref, so_ref, te_ref, to_ref, w_ref, b_ref = ins[3 + 6 * li:3 + 6 * (li + 1)]
        a = act.astype(COMPUTE_DTYPE)
        # vertical pool: exact 0/1 row selections (even / odd h), then max.
        r_ev = jnp.dot(se_ref[...], a, preferred_element_type=jnp.float32)
        r_od = jnp.dot(so_ref[...], a, preferred_element_type=jnp.float32)
        hpool = jnp.maximum(r_ev, r_od).astype(COMPUTE_DTYPE)
        # horizontal pool: exact 0/1 lane-block selections (even / odd w), then max.
        c_ev = jnp.dot(hpool, te_ref[...], preferred_element_type=jnp.float32)
        c_od = jnp.dot(hpool, to_ref[...], preferred_element_type=jnp.float32)
        pooled = jnp.maximum(c_ev, c_od).astype(COMPUTE_DTYPE)
        # 1x1 conv for every w position at once (block-diagonal weight, BN scale folded).
        acc = jnp.dot(pooled, w_ref[...], preferred_element_type=jnp.float32)
        act = jnp.maximum(acc + b_ref[...], 0.0)
        outs[li + 1][0] = act


# --------------------------- parameter preparation -------------------------

def init_gbblock_params(key, outc):
    """Random parameters matching the PyTorch module (Conv2d OIHW + BatchNorm2d)."""
    chans = [outc, outc * 4, outc * 8, outc * 16, outc * 32, outc * 64]
    params = []
    for li in range(NUM_LAYERS):
        cin, cout = chans[li], chans[li + 1]
        k = 4 if li == 0 else 1
        key, kw_, kb_, kg_, kbe_, km_, kv_ = jax.random.split(key, 7)
        params.append(dict(
            w_oihw=jax.random.normal(kw_, (cout, cin, k, k), jnp.float32) * 0.05,
            b=jax.random.normal(kb_, (cout,), jnp.float32) * 0.05,
            gamma=1.0 + 0.1 * jax.random.normal(kg_, (cout,), jnp.float32),
            beta=0.1 * jax.random.normal(kbe_, (cout,), jnp.float32),
            mean=0.1 * jax.random.normal(km_, (cout,), jnp.float32),
            var=jnp.abs(jax.random.normal(kv_, (cout,), jnp.float32)) + 0.5,
        ))
    return params


def _fold_bn(conv_bias, gamma, beta, mean, var):
    scale = np.asarray(gamma) / np.sqrt(np.asarray(var) + BN_EPS)
    shift = (np.asarray(conv_bias) - np.asarray(mean)) * scale + np.asarray(beta)
    return scale.astype(np.float32), shift.astype(np.float32)


def prepare_fused_operands(params, height, width):
    """Precompute constant kernel operands: BN-folded weights, pooling selectors, shifts."""
    assert height % 32 == 0 and width % 32 == 0, \
        "GBblock needs H, W divisible by 32 (five spatial halvings)."
    p0 = params[0]
    cout1, cin = int(p0["w_oihw"].shape[0]), int(p0["w_oihw"].shape[1])
    h1, w1 = height // 2, width // 2
    scale, shift = _fold_bn(p0["b"], p0["gamma"], p0["beta"], p0["mean"], p0["var"])
    w_hwio = np.transpose(np.asarray(p0["w_oihw"]), (2, 3, 1, 0))        # (4,4,cin,cout1)
    blk = 4 * cin                                                        # space-to-depth depth
    # Banded weight: rows = (di, b, rh, rw, cin) of the patch matrix, cols = (j, cout).
    w1_big = np.zeros((2 * (w1 + 1) * blk, w1 * cout1), np.float32)
    for di in range(2):
        for dj in range(2):
            sub = w_hwio[2 * di:2 * di + 2, 2 * dj:2 * dj + 2].reshape(blk, cout1)
            sub = sub * scale[None, :]
            for j in range(w1):
                r0 = di * (w1 + 1) * blk + (j + dj) * blk
                w1_big[r0:r0 + blk, j * cout1:(j + 1) * cout1] = sub
    operands = [jnp.asarray(w1_big, COMPUTE_DTYPE),
                jnp.asarray(np.tile(shift, w1).reshape(1, -1), jnp.float32)]

    h_in, w_in, c_in = h1, w1, cout1
    for p in params[1:]:
        c_out = int(p["w_oihw"].shape[0])
        h_out, w_out = h_in // 2, w_in // 2
        scale, shift = _fold_bn(p["b"], p["gamma"], p["beta"], p["mean"], p["var"])
        wmat = np.asarray(p["w_oihw"])[:, :, 0, 0].T * scale[None, :]    # (c_in, c_out)
        s_e = np.zeros((h_out, h_in), np.float32)
        s_o = np.zeros((h_out, h_in), np.float32)
        s_e[np.arange(h_out), 2 * np.arange(h_out)] = 1.0
        s_o[np.arange(h_out), 2 * np.arange(h_out) + 1] = 1.0
        e_e = np.zeros((w_in, w_out), np.float32)
        e_o = np.zeros((w_in, w_out), np.float32)
        e_e[2 * np.arange(w_out), np.arange(w_out)] = 1.0
        e_o[2 * np.arange(w_out) + 1, np.arange(w_out)] = 1.0
        eye_c = np.eye(c_in, dtype=np.float32)
        operands += [
            jnp.asarray(s_e, COMPUTE_DTYPE),                               # even-row selector
            jnp.asarray(s_o, COMPUTE_DTYPE),                               # odd-row selector
            jnp.asarray(np.kron(e_e, eye_c), COMPUTE_DTYPE),               # even-w lane-block selector
            jnp.asarray(np.kron(e_o, eye_c), COMPUTE_DTYPE),               # odd-w lane-block selector
            jnp.asarray(np.kron(np.eye(w_out, dtype=np.float32), wmat.astype(np.float32)),
                        COMPUTE_DTYPE),                                    # block-diagonal 1x1 conv
            jnp.asarray(np.tile(shift, w_out).reshape(1, -1), jnp.float32),
        ]
        h_in, w_in, c_in = h_out, w_out, c_out
    return operands


# --------------------------------- forward ---------------------------------

def gbblock_forward(coarse_feats_nchw, params, const_operands):
    n, cin, h, w = coarse_feats_nchw.shape
    h1, w1 = h // 2, w // 2
    chans = [int(p["w_oihw"].shape[0]) for p in params]
    hs = [h >> (l + 1) for l in range(NUM_LAYERS)]
    ws = [w >> (l + 1) for l in range(NUM_LAYERS)]

    # Layer-1 patch matrix: channels-last + pad(1) + 2x2 space-to-depth + vertical pair
    # duplication.  One cheap XLA pass over the tiny input (no 4x HBM im2col expansion).
    x = jnp.transpose(coarse_feats_nchw, (0, 2, 3, 1))
    xp = jnp.pad(x, ((0, 0), (1, 1), (1, 1), (0, 0)))
    s2d = xp.reshape(n, h1 + 1, 2, w1 + 1, 2, cin).transpose(0, 1, 3, 2, 4, 5)
    s2d = s2d.reshape(n, h1 + 1, (w1 + 1) * 4 * cin)
    patches = jnp.concatenate([s2d[:, :h1, :], s2d[:, 1:, :]], axis=-1)
    patches = patches.astype(COMPUTE_DTYPE)                    # (n, h1, 2*(w1+1)*4*cin)

    operands = [patches] + list(const_operands)
    in_specs = [pl.BlockSpec((1, h1, patches.shape[-1]), lambda b: (b, 0, 0))]
    in_specs += [pl.BlockSpec(op.shape, lambda b: (0, 0)) for op in const_operands]
    out_shape = [jax.ShapeDtypeStruct((n, hs[l], ws[l] * chans[l]), jnp.float32)
                 for l in range(NUM_LAYERS)]
    out_specs = [pl.BlockSpec((1, hs[l], ws[l] * chans[l]), lambda b: (b, 0, 0))
                 for l in range(NUM_LAYERS)]

    outs = pl.pallas_call(
        _gbblock_fused_kernel,
        out_shape=out_shape,
        grid=(n,),
        in_specs=in_specs,
        out_specs=out_specs,
        compiler_params=pltpu.CompilerParams(dimension_semantics=("parallel",)),
    )(*operands)

    # Back to the module's NCHW contract; channel-halving slices are on a major dim (cheap).
    xg_list, xb_list = [], []
    for l, o in enumerate(outs):
        t = o.reshape(n, hs[l], ws[l], chans[l])
        t = jnp.transpose(t, (0, 3, 1, 2))
        half = chans[l] // 2
        xb_list.append(t[:, :half])
        xg_list.append(t[:, half:])
    return tuple(xg_list + xb_list)                            # (xg1..xg5, xb1..xb5)


# ------------------------- pure-JAX reference check -------------------------

def _reference_forward(x_nchw, params):
    x = jnp.transpose(x_nchw, (0, 2, 3, 1))
    xg_list, xb_list = [], []
    for li, p in enumerate(params):
        w_hwio = jnp.transpose(p["w_oihw"], (2, 3, 1, 0))
        if li == 0:
            y = jax.lax.conv_general_dilated(
                x, w_hwio, window_strides=(2, 2), padding=((1, 1), (1, 1)),
                dimension_numbers=("NHWC", "HWIO", "NHWC"))
        else:
            x = jax.lax.reduce_window(x, -jnp.inf, jax.lax.max,
                                      (1, 2, 2, 1), (1, 2, 2, 1), "VALID")
            y = jnp.einsum("nhwc,co->nhwo", x, w_hwio[0, 0])
        y = y + p["b"]
        y = (y - p["mean"]) / jnp.sqrt(p["var"] + BN_EPS) * p["gamma"] + p["beta"]
        x = jnp.maximum(y, 0.0)
        c = x.shape[-1]
        xb_list.append(x[..., :c // 2])
        xg_list.append(x[..., c // 2:])
    to_nchw = lambda t: jnp.transpose(t, (0, 3, 1, 2))
    return tuple(to_nchw(t) for t in (xg_list + xb_list))


if __name__ == "__main__":
    key = jax.random.PRNGKey(0)
    kx, kp = jax.random.split(key)
    outc = 4
    coarse_feats = jax.random.normal(kx, (2, outc, 32, 32), jnp.float32)
    params = init_gbblock_params(kp, outc)
    const_ops = prepare_fused_operands(params, 32, 32)

    fwd = jax.jit(gbblock_forward)
    outs = jax.block_until_ready(fwd(coarse_feats, params, const_ops))
    refs = jax.block_until_ready(_reference_forward(coarse_feats, params))

    assert len(outs) == 10
    for o, r in zip(outs, refs):
        assert o.shape == r.shape, (o.shape, r.shape)
        # bf16 MXU operands (f32 accumulation) -> loosened per-element tolerance, plus a
        # tight global relative-L2 check that still catches any structural/indexing bug.
        # Setting COMPUTE_DTYPE = jnp.float32 restores ~1e-5 agreement.
        max_err = float(jnp.max(jnp.abs(o - r)))
        assert jnp.allclose(o, r, atol=5e-2, rtol=5e-2), max_err
        rel = float(jnp.linalg.norm(o - r) / (jnp.linalg.norm(r) + 1e-6))
        assert rel < 1e-2, rel

    print("KERNEL_OK")
</pallas_src>

<mosaic_0001>
module attributes {stable_mosaic.version = 11 : i64} {
  func.func @_gbblock_fused_kernel(%arg0: i32, %arg1: memref<1x16x544xbf16, #tpu.memory_space<vmem>>, %arg2: memref<544x256xbf16, #tpu.memory_space<vmem>>, %arg3: memref<1x256xf32, #tpu.memory_space<vmem>>, %arg4: memref<8x16xbf16, #tpu.memory_space<vmem>>, %arg5: memref<8x16xbf16, #tpu.memory_space<vmem>>, %arg6: memref<256x128xbf16, #tpu.memory_space<vmem>>, %arg7: memref<256x128xbf16, #tpu.memory_space<vmem>>, %arg8: memref<128x256xbf16, #tpu.memory_space<vmem>>, %arg9: memref<1x256xf32, #tpu.memory_space<vmem>>, %arg10: memref<4x8xbf16, #tpu.memory_space<vmem>>, %arg11: memref<4x8xbf16, #tpu.memory_space<vmem>>, %arg12: memref<256x128xbf16, #tpu.memory_space<vmem>>, %arg13: memref<256x128xbf16, #tpu.memory_space<vmem>>, %arg14: memref<128x256xbf16, #tpu.memory_space<vmem>>, %arg15: memref<1x256xf32, #tpu.memory_space<vmem>>, %arg16: memref<2x4xbf16, #tpu.memory_space<vmem>>, %arg17: memref<2x4xbf16, #tpu.memory_space<vmem>>, %arg18: memref<256x128xbf16, #tpu.memory_space<vmem>>, %arg19: memref<256x128xbf16, #tpu.memory_space<vmem>>, %arg20: memref<128x256xbf16, #tpu.memory_space<vmem>>, %arg21: memref<1x256xf32, #tpu.memory_space<vmem>>, %arg22: memref<1x2xbf16, #tpu.memory_space<vmem>>, %arg23: memref<1x2xbf16, #tpu.memory_space<vmem>>, %arg24: memref<256x128xbf16, #tpu.memory_space<vmem>>, %arg25: memref<256x128xbf16, #tpu.memory_space<vmem>>, %arg26: memref<128x256xbf16, #tpu.memory_space<vmem>>, %arg27: memref<1x256xf32, #tpu.memory_space<vmem>>, %arg28: memref<1x16x256xf32, #tpu.memory_space<vmem>>, %arg29: memref<1x8x256xf32, #tpu.memory_space<vmem>>, %arg30: memref<1x4x256xf32, #tpu.memory_space<vmem>>, %arg31: memref<1x2x256xf32, #tpu.memory_space<vmem>>, %arg32: memref<1x1x256xf32, #tpu.memory_space<vmem>>) attributes {dimension_semantics = [#tpu.dimension_semantics<parallel>], iteration_bounds = array<i64: 2>, scalar_prefetch = 0 : i64, scratch_operands = 0 : i64, tpu.core_type = #tpu.core_type<tc>, window_params = [{transform_indices = @transform_0, window_bounds = array<i64: 1, 16, 544>}, {pipeline_mode = #tpu.pipeline_mode<synchronous>, transform_indices = @transform_1, window_bounds = array<i64: 544, 256>}, {pipeline_mode = #tpu.pipeline_mode<synchronous>, transform_indices = @transform_2, window_bounds = array<i64: 1, 256>}, {pipeline_mode = #tpu.pipeline_mode<synchronous>, transform_indices = @transform_3, window_bounds = array<i64: 8, 16>}, {pipeline_mode = #tpu.pipeline_mode<synchronous>, transform_indices = @transform_4, window_bounds = array<i64: 8, 16>}, {pipeline_mode = #tpu.pipeline_mode<synchronous>, transform_indices = @transform_5, window_bounds = array<i64: 256, 128>}, {pipeline_mode = #tpu.pipeline_mode<synchronous>, transform_indices = @transform_6, window_bounds = array<i64: 256, 128>}, {pipeline_mode = #tpu.pipeline_mode<synchronous>, transform_indices = @transform_7, window_bounds = array<i64: 128, 256>}, {pipeline_mode = #tpu.pipeline_mode<synchronous>, transform_indices = @transform_8, window_bounds = array<i64: 1, 256>}, {pipeline_mode = #tpu.pipeline_mode<synchronous>, transform_indices = @transform_9, window_bounds = array<i64: 4, 8>}, {pipeline_mode = #tpu.pipeline_mode<synchronous>, transform_indices = @transform_10, window_bounds = array<i64: 4, 8>}, {pipeline_mode = #tpu.pipeline_mode<synchronous>, transform_indices = @transform_11, window_bounds = array<i64: 256, 128>}, {pipeline_mode = #tpu.pipeline_mode<synchronous>, transform_indices = @transform_12, window_bounds = array<i64: 256, 128>}, {pipeline_mode = #tpu.pipeline_mode<synchronous>, transform_indices = @transform_13, window_bounds = array<i64: 128, 256>}, {pipeline_mode = #tpu.pipeline_mode<synchronous>, transform_indices = @transform_14, window_bounds = array<i64: 1, 256>}, {pipeline_mode = #tpu.pipeline_mode<synchronous>, transform_indices = @transform_15, window_bounds = array<i64: 2, 4>}, {pipeline_mode = #tpu.pipeline_mode<synchronous>, transform_indices = @transform_16, window_bounds = array<i64: 2, 4>}, {pipeline_mode = #tpu.pipeline_mode<synchronous>, transform_indices = @transform_17, window_bounds = array<i64: 256, 128>}, {pipeline_mode = #tpu.pipeline_mode<synchronous>, transform_indices = @transform_18, window_bounds = array<i64: 256, 128>}, {pipeline_mode = #tpu.pipeline_mode<synchronous>, transform_indices = @transform_19, window_bounds = array<i64: 128, 256>}, {pipeline_mode = #tpu.pipeline_mode<synchronous>, transform_indices = @transform_20, window_bounds = array<i64: 1, 256>}, {pipeline_mode = #tpu.pipeline_mode<synchronous>, transform_indices = @transform_21, window_bounds = array<i64: 1, 2>}, {pipeline_mode = #tpu.pipeline_mode<synchronous>, transform_indices = @transform_22, window_bounds = array<i64: 1, 2>}, {pipeline_mode = #tpu.pipeline_mode<synchronous>, transform_indices = @transform_23, window_bounds = array<i64: 256, 128>}, {pipeline_mode = #tpu.pipeline_mode<synchronous>, transform_indices = @transform_24, window_bounds = array<i64: 256, 128>}, {pipeline_mode = #tpu.pipeline_mode<synchronous>, transform_indices = @transform_25, window_bounds = array<i64: 128, 256>}, {pipeline_mode = #tpu.pipeline_mode<synchronous>, transform_indices = @transform_26, window_bounds = array<i64: 1, 256>}, {transform_indices = @transform_27, window_bounds = array<i64: 1, 16, 256>}, {transform_indices = @transform_28, window_bounds = array<i64: 1, 8, 256>}, {transform_indices = @transform_29, window_bounds = array<i64: 1, 4, 256>}, {transform_indices = @transform_30, window_bounds = array<i64: 1, 2, 256>}, {transform_indices = @transform_31, window_bounds = array<i64: 1, 1, 256>}]} {
    %c0 = arith.constant 0 : index
    %c0_0 = arith.constant 0 : index
    %c0_1 = arith.constant 0 : index
    %0 = vector.load %arg1[%c0, %c0_0, %c0_1] : memref<1x16x544xbf16, #tpu.memory_space<vmem>>, vector<1x16x544xbf16>
    %1 = vector.shape_cast %0 : vector<1x16x544xbf16> to vector<16x544xbf16>
    %c0_2 = arith.constant 0 : index
    %c0_3 = arith.constant 0 : index
    %2 = vector.load %arg2[%c0_2, %c0_3] : memref<544x256xbf16, #tpu.memory_space<vmem>>, vector<544x256xbf16>
    %cst = arith.constant dense<0.000000e+00> : vector<16x256xf32>
    %3 = tpu.matmul %1, %2, %cst {dimension_numbers = #tpu.dot_dimension_numbers<[1], [0], [0], [1], [0, 0, 1, 1], [], []>} : vector<16x544xbf16>, vector<544x256xbf16>, vector<16x256xf32> -> vector<16x256xf32>
    %c0_4 = arith.constant 0 : index
    %c0_5 = arith.constant 0 : index
    %4 = vector.load %arg3[%c0_4, %c0_5] : memref<1x256xf32, #tpu.memory_space<vmem>>, vector<1x256xf32>
    %5 = vector.broadcast %4 : vector<1x256xf32> to vector<16x256xf32>
    %6 = arith.addf %3, %5 : vector<16x256xf32>
    %cst_6 = arith.constant 0.000000e+00 : f32
    %7 = vector.broadcast %cst_6 : f32 to vector<16x256xf32>
    %8 = arith.maximumf %6, %7 : vector<16x256xf32>
    %c0_7 = arith.constant 0 : index
    %c0_8 = arith.constant 0 : index
    %c0_9 = arith.constant 0 : index
    %9 = vector.load %arg28[%c0_7, %c0_8, %c0_9] : memref<1x16x256xf32, #tpu.memory_space<vmem>>, vector<1x16x256xf32>
    %10 = vector.shape_cast %9 : vector<1x16x256xf32> to vector<16x256xf32>
    %11 = vector.shape_cast %8 : vector<16x256xf32> to vector<1x16x256xf32>
    tpu.vector_store %arg28[%c0_7, %c0_8, %c0_9], %11 {strides = array<i32>} : memref<1x16x256xf32, #tpu.memory_space<vmem>>, vector<1x16x256xf32>,
    %12 = arith.truncf %8 : vector<16x256xf32> to vector<16x256xbf16>
    %c0_10 = arith.constant 0 : index
    %c0_11 = arith.constant 0 : index
    %13 = vector.load %arg4[%c0_10, %c0_11] : memref<8x16xbf16, #tpu.memory_space<vmem>>, vector<8x16xbf16>
    %cst_12 = arith.constant dense<0.000000e+00> : vector<8x256xf32>
    %14 = tpu.matmul %13, %12, %cst_12 {dimension_numbers = #tpu.dot_dimension_numbers<[1], [0], [0], [1], [0, 0, 1, 1], [], []>} : vector<8x16xbf16>, vector<16x256xbf16>, vector<8x256xf32> -> vector<8x256xf32>
    %c0_13 = arith.constant 0 : index
    %c0_14 = arith.constant 0 : index
    %15 = vector.load %arg5[%c0_13, %c0_14] : memref<8x16xbf16, #tpu.memory_space<vmem>>, vector<8x16xbf16>
    %cst_15 = arith.constant dense<0.000000e+00> : vector<8x256xf32>
    %16 = tpu.matmul %15, %12, %cst_15 {dimension_numbers = #tpu.dot_dimension_numbers<[1], [0], [0], [1], [0, 0, 1, 1], [], []>} : vector<8x16xbf16>, vector<16x256xbf16>, vector<8x256xf32> -> vector<8x256xf32>
    %17 = arith.maximumf %14, %16 : vector<8x256xf32>
    %18 = arith.truncf %17 : vector<8x256xf32> to vector<8x256xbf16>
    %c0_16 = arith.constant 0 : index
    %c0_17 = arith.constant 0 : index
    %19 = vector.load %arg6[%c0_16, %c0_17] : memref<256x128xbf16, #tpu.memory_space<vmem>>, vector<256x128xbf16>
    %cst_18 = arith.constant dense<0.000000e+00> : vector<8x128xf32>
    %20 = tpu.matmul %18, %19, %cst_18 {dimension_numbers = #tpu.dot_dimension_numbers<[1], [0], [0], [1], [0, 0, 1, 1], [], []>} : vector<8x256xbf16>, vector<256x128xbf16>, vector<8x128xf32> -> vector<8x128xf32>
    %c0_19 = arith.constant 0 : index
    %c0_20 = arith.constant 0 : index
    %21 = vector.load %arg7[%c0_19, %c0_20] : memref<256x128xbf16, #tpu.memory_space<vmem>>, vector<256x128xbf16>
    %cst_21 = arith.constant dense<0.000000e+00> : vector<8x128xf32>
    %22 = tpu.matmul %18, %21, %cst_21 {dimension_numbers = #tpu.dot_dimension_numbers<[1], [0], [0], [1], [0, 0, 1, 1], [], []>} : vector<8x256xbf16>, vector<256x128xbf16>, vector<8x128xf32> -> vector<8x128xf32>
    %23 = arith.maximumf %20, %22 : vector<8x128xf32>
    %24 = arith.truncf %23 : vector<8x128xf32> to vector<8x128xbf16>
    %c0_22 = arith.constant 0 : index
    %c0_23 = arith.constant 0 : index
    %25 = vector.load %arg8[%c0_22, %c0_23] : memref<128x256xbf16, #tpu.memory_space<vmem>>, vector<128x256xbf16>
    %cst_24 = arith.constant dense<0.000000e+00> : vector<8x256xf32>
    %26 = tpu.matmul %24, %25, %cst_24 {dimension_numbers = #tpu.dot_dimension_numbers<[1], [0], [0], [1], [0, 0, 1, 1], [], []>} : vector<8x128xbf16>, vector<128x256xbf16>, vector<8x256xf32> -> vector<8x256xf32>
    %c0_25 = arith.constant 0 : index
    %c0_26 = arith.constant 0 : index
    %27 = vector.load %arg9[%c0_25, %c0_26] : memref<1x256xf32, #tpu.memory_space<vmem>>, vector<1x256xf32>
    %28 = vector.broadcast %27 : vector<1x256xf32> to vector<8x256xf32>
    %29 = arith.addf %26, %28 : vector<8x256xf32>
    %cst_27 = arith.constant 0.000000e+00 : f32
    %30 = vector.broadcast %cst_27 : f32 to vector<8x256xf32>
    %31 = arith.maximumf %29, %30 : vector<8x256xf32>
    %c0_28 = arith.constant 0 : index
    %c0_29 = arith.constant 0 : index
    %c0_30 = arith.constant 0 : index
    %32 = vector.load %arg29[%c0_28, %c0_29, %c0_30] : memref<1x8x256xf32, #tpu.memory_space<vmem>>, vector<1x8x256xf32>
    %33 = vector.shape_cast %32 : vector<1x8x256xf32> to vector<8x256xf32>
    %34 = vector.shape_cast %31 : vector<8x256xf32> to vector<1x8x256xf32>
    tpu.vector_store %arg29[%c0_28, %c0_29, %c0_30], %34 {strides = array<i32>} : memref<1x8x256xf32, #tpu.memory_space<vmem>>, vector<1x8x256xf32>,
    %35 = arith.truncf %31 : vector<8x256xf32> to vector<8x256xbf16>
    %c0_31 = arith.constant 0 : index
    %c0_32 = arith.constant 0 : index
    %36 = vector.load %arg10[%c0_31, %c0_32] : memref<4x8xbf16, #tpu.memory_space<vmem>>, vector<4x8xbf16>
    %cst_33 = arith.constant dense<0.000000e+00> : vector<4x256xf32>
    %37 = tpu.matmul %36, %35, %cst_33 {dimension_numbers = #tpu.dot_dimension_numbers<[1], [0], [0], [1], [0, 0, 1, 1], [], []>} : vector<4x8xbf16>, vector<8x256xbf16>, vector<4x256xf32> -> vector<4x256xf32>
    %c0_34 = arith.constant 0 : index
    %c0_35 = arith.constant 0 : index
    %38 = vector.load %arg11[%c0_34, %c0_35] : memref<4x8xbf16, #tpu.memory_space<vmem>>, vector<4x8xbf16>
    %cst_36 = arith.constant dense<0.000000e+00> : vector<4x256xf32>
    %39 = tpu.matmul %38, %35, %cst_36 {dimension_numbers = #tpu.dot_dimension_numbers<[1], [0], [0], [1], [0, 0, 1, 1], [], []>} : vector<4x8xbf16>, vector<8x256xbf16>, vector<4x256xf32> -> vector<4x256xf32>
    %40 = arith.maximumf %37, %39 : vector<4x256xf32>
    %41 = arith.truncf %40 : vector<4x256xf32> to vector<4x256xbf16>
    %c0_37 = arith.constant 0 : index
    %c0_38 = arith.constant 0 : index
    %42 = vector.load %arg12[%c0_37, %c0_38] : memref<256x128xbf16, #tpu.memory_space<vmem>>, vector<256x128xbf16>
    %cst_39 = arith.constant dense<0.000000e+00> : vector<4x128xf32>
    %43 = tpu.matmul %41, %42, %cst_39 {dimension_numbers = #tpu.dot_dimension_numbers<[1], [0], [0], [1], [0, 0, 1, 1], [], []>} : vector<4x256xbf16>, vector<256x128xbf16>, vector<4x128xf32> -> vector<4x128xf32>
    %c0_40 = arith.constant 0 : index
    %c0_41 = arith.constant 0 : index
    %44 = vector.load %arg13[%c0_40, %c0_41] : memref<256x128xbf16, #tpu.memory_space<vmem>>, vector<256x128xbf16>
    %cst_42 = arith.constant dense<0.000000e+00> : vector<4x128xf32>
    %45 = tpu.matmul %41, %44, %cst_42 {dimension_numbers = #tpu.dot_dimension_numbers<[1], [0], [0], [1], [0, 0, 1, 1], [], []>} : vector<4x256xbf16>, vector<256x128xbf16>, vector<4x128xf32> -> vector<4x128xf32>
    %46 = arith.maximumf %43, %45 : vector<4x128xf32>
    %47 = arith.truncf %46 : vector<4x128xf32> to vector<4x128xbf16>
    %c0_43 = arith.constant 0 : index
    %c0_44 = arith.constant 0 : index
    %48 = vector.load %arg14[%c0_43, %c0_44] : memref<128x256xbf16, #tpu.memory_space<vmem>>, vector<128x256xbf16>
    %cst_45 = arith.constant dense<0.000000e+00> : vector<4x256xf32>
    %49 = tpu.matmul %47, %48, %cst_45 {dimension_numbers = #tpu.dot_dimension_numbers<[1], [0], [0], [1], [0, 0, 1, 1], [], []>} : vector<4x128xbf16>, vector<128x256xbf16>, vector<4x256xf32> -> vector<4x256xf32>
    %c0_46 = arith.constant 0 : index
    %c0_47 = arith.constant 0 : index
    %50 = vector.load %arg15[%c0_46, %c0_47] : memref<1x256xf32, #tpu.memory_space<vmem>>, vector<1x256xf32>
    %51 = vector.broadcast %50 : vector<1x256xf32> to vector<4x256xf32>
    %52 = arith.addf %49, %51 : vector<4x256xf32>
    %cst_48 = arith.constant 0.000000e+00 : f32
    %53 = vector.broadcast %cst_48 : f32 to vector<4x256xf32>
    %54 = arith.maximumf %52, %53 : vector<4x256xf32>
    %c0_49 = arith.constant 0 : index
    %c0_50 = arith.constant 0 : index
    %c0_51 = arith.constant 0 : index
    %55 = vector.load %arg30[%c0_49, %c0_50, %c0_51] : memref<1x4x256xf32, #tpu.memory_space<vmem>>, vector<1x4x256xf32>
    %56 = vector.shape_cast %55 : vector<1x4x256xf32> to vector<4x256xf32>
    %57 = vector.shape_cast %54 : vector<4x256xf32> to vector<1x4x256xf32>
    tpu.vector_store %arg30[%c0_49, %c0_50, %c0_51], %57 {strides = array<i32>} : memref<1x4x256xf32, #tpu.memory_space<vmem>>, vector<1x4x256xf32>,
    %58 = arith.truncf %54 : vector<4x256xf32> to vector<4x256xbf16>
    %c0_52 = arith.constant 0 : index
    %c0_53 = arith.constant 0 : index
    %59 = vector.load %arg16[%c0_52, %c0_53] : memref<2x4xbf16, #tpu.memory_space<vmem>>, vector<2x4xbf16>
    %cst_54 = arith.constant dense<0.000000e+00> : vector<2x256xf32>
    %60 = tpu.matmul %59, %58, %cst_54 {dimension_numbers = #tpu.dot_dimension_numbers<[1], [0], [0], [1], [0, 0, 1, 1], [], []>} : vector<2x4xbf16>, vector<4x256xbf16>, vector<2x256xf32> -> vector<2x256xf32>
    %c0_55 = arith.constant 0 : index
    %c0_56 = arith.constant 0 : index
    %61 = vector.load %arg17[%c0_55, %c0_56] : memref<2x4xbf16, #tpu.memory_space<vmem>>, vector<2x4xbf16>
    %cst_57 = arith.constant dense<0.000000e+00> : vector<2x256xf32>
    %62 = tpu.matmul %61, %58, %cst_57 {dimension_numbers = #tpu.dot_dimension_numbers<[1], [0], [0], [1], [0, 0, 1, 1], [], []>} : vector<2x4xbf16>, vector<4x256xbf16>, vector<2x256xf32> -> vector<2x256xf32>
    %63 = arith.maximumf %60, %62 : vector<2x256xf32>
    %64 = arith.truncf %63 : vector<2x256xf32> to vector<2x256xbf16>
    %c0_58 = arith.constant 0 : index
    %c0_59 = arith.constant 0 : index
    %65 = vector.load %arg18[%c0_58, %c0_59] : memref<256x128xbf16, #tpu.memory_space<vmem>>, vector<256x128xbf16>
    %cst_60 = arith.constant dense<0.000000e+00> : vector<2x128xf32>
    %66 = tpu.matmul %64, %65, %cst_60 {dimension_numbers = #tpu.dot_dimension_numbers<[1], [0], [0], [1], [0, 0, 1, 1], [], []>} : vector<2x256xbf16>, vector<256x128xbf16>, vector<2x128xf32> -> vector<2x128xf32>
    %c0_61 = arith.constant 0 : index
    %c0_62 = arith.constant 0 : index
    %67 = vector.load %arg19[%c0_61, %c0_62] : memref<256x128xbf16, #tpu.memory_space<vmem>>, vector<256x128xbf16>
    %cst_63 = arith.constant dense<0.000000e+00> : vector<2x128xf32>
    %68 = tpu.matmul %64, %67, %cst_63 {dimension_numbers = #tpu.dot_dimension_numbers<[1], [0], [0], [1], [0, 0, 1, 1], [], []>} : vector<2x256xbf16>, vector<256x128xbf16>, vector<2x128xf32> -> vector<2x128xf32>
    %69 = arith.maximumf %66, %68 : vector<2x128xf32>
    %70 = arith.truncf %69 : vector<2x128xf32> to vector<2x128xbf16>
    %c0_64 = arith.constant 0 : index
    %c0_65 = arith.constant 0 : index
    %71 = vector.load %arg20[%c0_64, %c0_65] : memref<128x256xbf16, #tpu.memory_space<vmem>>, vector<128x256xbf16>
    %cst_66 = arith.constant dense<0.000000e+00> : vector<2x256xf32>
    %72 = tpu.matmul %70, %71, %cst_66 {dimension_numbers = #tpu.dot_dimension_numbers<[1], [0], [0], [1], [0, 0, 1, 1], [], []>} : vector<2x128xbf16>, vector<128x256xbf16>, vector<2x256xf32> -> vector<2x256xf32>
    %c0_67 = arith.constant 0 : index
    %c0_68 = arith.constant 0 : index
    %73 = vector.load %arg21[%c0_67, %c0_68] : memref<1x256xf32, #tpu.memory_space<vmem>>, vector<1x256xf32>
    %74 = vector.broadcast %73 : vector<1x256xf32> to vector<2x256xf32>
    %75 = arith.addf %72, %74 : vector<2x256xf32>
    %cst_69 = arith.constant 0.000000e+00 : f32
    %76 = vector.broadcast %cst_69 : f32 to vector<2x256xf32>
    %77 = arith.maximumf %75, %76 : vector<2x256xf32>
    %c0_70 = arith.constant 0 : index
    %c0_71 = arith.constant 0 : index
    %c0_72 = arith.constant 0 : index
    %78 = vector.load %arg31[%c0_70, %c0_71, %c0_72] : memref<1x2x256xf32, #tpu.memory_space<vmem>>, vector<1x2x256xf32>
    %79 = vector.shape_cast %78 : vector<1x2x256xf32> to vector<2x256xf32>
    %80 = vector.shape_cast %77 : vector<2x256xf32> to vector<1x2x256xf32>
    tpu.vector_store %arg31[%c0_70, %c0_71, %c0_72], %80 {strides = array<i32>} : memref<1x2x256xf32, #tpu.memory_space<vmem>>, vector<1x2x256xf32>,
    %81 = arith.truncf %77 : vector<2x256xf32> to vector<2x256xbf16>
    %c0_73 = arith.constant 0 : index
    %c0_74 = arith.constant 0 : index
    %82 = vector.load %arg22[%c0_73, %c0_74] : memref<1x2xbf16, #tpu.memory_space<vmem>>, vector<1x2xbf16>
    %cst_75 = arith.constant dense<0.000000e+00> : vector<1x256xf32>
    %83 = tpu.matmul %82, %81, %cst_75 {dimension_numbers = #tpu.dot_dimension_numbers<[1], [0], [0], [1], [0, 0, 1, 1], [], []>} : vector<1x2xbf16>, vector<2x256xbf16>, vector<1x256xf32> -> vector<1x256xf32>
    %c0_76 = arith.constant 0 : index
    %c0_77 = arith.constant 0 : index
    %84 = vector.load %arg23[%c0_76, %c0_77] : memref<1x2xbf16, #tpu.memory_space<vmem>>, vector<1x2xbf16>
    %cst_78 = arith.constant dense<0.000000e+00> : vector<1x256xf32>
    %85 = tpu.matmul %84, %81, %cst_78 {dimension_numbers = #tpu.dot_dimension_numbers<[1], [0], [0], [1], [0, 0, 1, 1], [], []>} : vector<1x2xbf16>, vector<2x256xbf16>, vector<1x256xf32> -> vector<1x256xf32>
    %86 = arith.maximumf %83, %85 : vector<1x256xf32>
    %87 = arith.truncf %86 : vector<1x256xf32> to vector<1x256xbf16>
    %c0_79 = arith.constant 0 : index
    %c0_80 = arith.constant 0 : index
    %88 = vector.load %arg24[%c0_79, %c0_80] : memref<256x128xbf16, #tpu.memory_space<vmem>>, vector<256x128xbf16>
    %cst_81 = arith.constant dense<0.000000e+00> : vector<1x128xf32>
    %89 = tpu.matmul %87, %88, %cst_81 {dimension_numbers = #tpu.dot_dimension_numbers<[1], [0], [0], [1], [0, 0, 1, 1], [], []>} : vector<1x256xbf16>, vector<256x128xbf16>, vector<1x128xf32> -> vector<1x128xf32>
    %c0_82 = arith.constant 0 : index
    %c0_83 = arith.constant 0 : index
    %90 = vector.load %arg25[%c0_82, %c0_83] : memref<256x128xbf16, #tpu.memory_space<vmem>>, vector<256x128xbf16>
    %cst_84 = arith.constant dense<0.000000e+00> : vector<1x128xf32>
    %91 = tpu.matmul %87, %90, %cst_84 {dimension_numbers = #tpu.dot_dimension_numbers<[1], [0], [0], [1], [0, 0, 1, 1], [], []>} : vector<1x256xbf16>, vector<256x128xbf16>, vector<1x128xf32> -> vector<1x128xf32>
    %92 = arith.maximumf %89, %91 : vector<1x128xf32>
    %93 = arith.truncf %92 : vector<1x128xf32> to vector<1x128xbf16>
    %c0_85 = arith.constant 0 : index
    %c0_86 = arith.constant 0 : index
    %94 = vector.load %arg26[%c0_85, %c0_86] : memref<128x256xbf16, #tpu.memory_space<vmem>>, vector<128x256xbf16>
    %cst_87 = arith.constant dense<0.000000e+00> : vector<1x256xf32>
    %95 = tpu.matmul %93, %94, %cst_87 {dimension_numbers = #tpu.dot_dimension_numbers<[1], [0], [0], [1], [0, 0, 1, 1], [], []>} : vector<1x128xbf16>, vector<128x256xbf16>, vector<1x256xf32> -> vector<1x256xf32>
    %c0_88 = arith.constant 0 : index
    %c0_89 = arith.constant 0 : index
    %96 = vector.load %arg27[%c0_88, %c0_89] : memref<1x256xf32, #tpu.memory_space<vmem>>, vector<1x256xf32>
    %97 = arith.addf %95, %96 : vector<1x256xf32>
    %cst_90 = arith.constant 0.000000e+00 : f32
    %98 = vector.broadcast %cst_90 : f32 to vector<1x256xf32>
    %99 = arith.maximumf %97, %98 : vector<1x256xf32>
    %c0_91 = arith.constant 0 : index
    %c0_92 = arith.constant 0 : index
    %c0_93 = arith.constant 0 : index
    %100 = vector.load %arg32[%c0_91, %c0_92, %c0_93] : memref<1x1x256xf32, #tpu.memory_space<vmem>>, vector<1x1x256xf32>
    %101 = vector.shape_cast %100 : vector<1x1x256xf32> to vector<1x256xf32>
    %102 = vector.shape_cast %99 : vector<1x256xf32> to vector<1x1x256xf32>
    tpu.vector_store %arg32[%c0_91, %c0_92, %c0_93], %102 {strides = array<i32>} : memref<1x1x256xf32, #tpu.memory_space<vmem>>, vector<1x1x256xf32>,
    return
  }
  func.func @transform_0(%arg0: i32) -> (i32, i32, i32) {
    %c0_i32 = arith.constant 0 : i32
    %c0_i32_0 = arith.constant 0 : i32
    %c0_i32_1 = arith.constant 0 : i32
    return %arg0, %c0_i32, %c0_i32_0 : i32, i32, i32
  }
  func.func @transform_1(%arg0: i32) -> (i32, i32) {
    %c0_i32 = arith.constant 0 : i32
    %c0_i32_0 = arith.constant 0 : i32
    %c0_i32_1 = arith.constant 0 : i32
    return %c0_i32, %c0_i32_0 : i32, i32
  }
  func.func @transform_2(%arg0: i32) -> (i32, i32) {
    %c0_i32 = arith.constant 0 : i32
    %c0_i32_0 = arith.constant 0 : i32
    %c0_i32_1 = arith.constant 0 : i32
    return %c0_i32, %c0_i32_0 : i32, i32
  }
  func.func @transform_3(%arg0: i32) -> (i32, i32) {
    %c0_i32 = arith.constant 0 : i32
    %c0_i32_0 = arith.constant 0 : i32
    %c0_i32_1 = arith.constant 0 : i32
    return %c0_i32, %c0_i32_0 : i32, i32
  }
  func.func @transform_4(%arg0: i32) -> (i32, i32) {
    %c0_i32 = arith.constant 0 : i32
    %c0_i32_0 = arith.constant 0 : i32
    %c0_i32_1 = arith.constant 0 : i32
    return %c0_i32, %c0_i32_0 : i32, i32
  }
  func.func @transform_5(%arg0: i32) -> (i32, i32) {
    %c0_i32 = arith.constant 0 : i32
    %c0_i32_0 = arith.constant 0 : i32
    %c0_i32_1 = arith.constant 0 : i32
    return %c0_i32, %c0_i32_0 : i32, i32
  }
  func.func @transform_6(%arg0: i32) -> (i32, i32) {
    %c0_i32 = arith.constant 0 : i32
    %c0_i32_0 = arith.constant 0 : i32
    %c0_i32_1 = arith.constant 0 : i32
    return %c0_i32, %c0_i32_0 : i32, i32
  }
  func.func @transform_7(%arg0: i32) -> (i32, i32) {
    %c0_i32 = arith.constant 0 : i32
    %c0_i32_0 = arith.constant 0 : i32
    %c0_i32_1 = arith.constant 0 : i32
    return %c0_i32, %c0_i32_0 : i32, i32
  }
  func.func @transform_8(%arg0: i32) -> (i32, i32) {
    %c0_i32 = arith.constant 0 : i32
    %c0_i32_0 = arith.constant 0 : i32
    %c0_i32_1 = arith.constant 0 : i32
    return %c0_i32, %c0_i32_0 : i32, i32
  }
  func.func @transform_9(%arg0: i32) -> (i32, i32) {
    %c0_i32 = arith.constant 0 : i32
    %c0_i32_0 = arith.constant 0 : i32
    %c0_i32_1 = arith.constant 0 : i32
    return %c0_i32, %c0_i32_0 : i32, i32
  }
  func.func @transform_10(%arg0: i32) -> (i32, i32) {
    %c0_i32 = arith.constant 0 : i32
    %c0_i32_0 = arith.constant 0 : i32
    %c0_i32_1 = arith.constant 0 : i32
    return %c0_i32, %c0_i32_0 : i32, i32
  }
  func.func @transform_11(%arg0: i32) -> (i32, i32) {
    %c0_i32 = arith.constant 0 : i32
    %c0_i32_0 = arith.constant 0 : i32
    %c0_i32_1 = arith.constant 0 : i32
    return %c0_i32, %c0_i32_0 : i32, i32
  }
  func.func @transform_12(%arg0: i32) -> (i32, i32) {
    %c0_i32 = arith.constant 0 : i32
    %c0_i32_0 = arith.constant 0 : i32
    %c0_i32_1 = arith.constant 0 : i32
    return %c0_i32, %c0_i32_0 : i32, i32
  }
  func.func @transform_13(%arg0: i32) -> (i32, i32) {
    %c0_i32 = arith.constant 0 : i32
    %c0_i32_0 = arith.constant 0 : i32
    %c0_i32_1 = arith.constant 0 : i32
    return %c0_i32, %c0_i32_0 : i32, i32
  }
  func.func @transform_14(%arg0: i32) -> (i32, i32) {
    %c0_i32 = arith.constant 0 : i32
    %c0_i32_0 = arith.constant 0 : i32
    %c0_i32_1 = arith.constant 0 : i32
    return %c0_i32, %c0_i32_0 : i32, i32
  }
  func.func @transform_15(%arg0: i32) -> (i32, i32) {
    %c0_i32 = arith.constant 0 : i32
    %c0_i32_0 = arith.constant 0 : i32
    %c0_i32_1 = arith.constant 0 : i32
    return %c0_i32, %c0_i32_0 : i32, i32
  }
  func.func @transform_16(%arg0: i32) -> (i32, i32) {
    %c0_i32 = arith.constant 0 : i32
    %c0_i32_0 = arith.constant 0 : i32
    %c0_i32_1 = arith.constant 0 : i32
    return %c0_i32, %c0_i32_0 : i32, i32
  }
  func.func @transform_17(%arg0: i32) -> (i32, i32) {
    %c0_i32 = arith.constant 0 : i32
    %c0_i32_0 = arith.constant 0 : i32
    %c0_i32_1 = arith.constant 0 : i32
    return %c0_i32, %c0_i32_0 : i32, i32
  }
  func.func @transform_18(%arg0: i32) -> (i32, i32) {
    %c0_i32 = arith.constant 0 : i32
    %c0_i32_0 = arith.constant 0 : i32
    %c0_i32_1 = arith.constant 0 : i32
    return %c0_i32, %c0_i32_0 : i32, i32
  }
  func.func @transform_19(%arg0: i32) -> (i32, i32) {
    %c0_i32 = arith.constant 0 : i32
    %c0_i32_0 = arith.constant 0 : i32
    %c0_i32_1 = arith.constant 0 : i32
    return %c0_i32, %c0_i32_0 : i32, i32
  }
  func.func @transform_20(%arg0: i32) -> (i32, i32) {
    %c0_i32 = arith.constant 0 : i32
    %c0_i32_0 = arith.constant 0 : i32
    %c0_i32_1 = arith.constant 0 : i32
    return %c0_i32, %c0_i32_0 : i32, i32
  }
  func.func @transform_21(%arg0: i32) -> (i32, i32) {
    %c0_i32 = arith.constant 0 : i32
    %c0_i32_0 = arith.constant 0 : i32
    %c0_i32_1 = arith.constant 0 : i32
    return %c0_i32, %c0_i32_0 : i32, i32
  }
  func.func @transform_22(%arg0: i32) -> (i32, i32) {
    %c0_i32 = arith.constant 0 : i32
    %c0_i32_0 = arith.constant 0 : i32
    %c0_i32_1 = arith.constant 0 : i32
    return %c0_i32, %c0_i32_0 : i32, i32
  }
  func.func @transform_23(%arg0: i32) -> (i32, i32) {
    %c0_i32 = arith.constant 0 : i32
    %c0_i32_0 = arith.constant 0 : i32
    %c0_i32_1 = arith.constant 0 : i32
    return %c0_i32, %c0_i32_0 : i32, i32
  }
  func.func @transform_24(%arg0: i32) -> (i32, i32) {
    %c0_i32 = arith.constant 0 : i32
    %c0_i32_0 = arith.constant 0 : i32
    %c0_i32_1 = arith.constant 0 : i32
    return %c0_i32, %c0_i32_0 : i32, i32
  }
  func.func @transform_25(%arg0: i32) -> (i32, i32) {
    %c0_i32 = arith.constant 0 : i32
    %c0_i32_0 = arith.constant 0 : i32
    %c0_i32_1 = arith.constant 0 : i32
    return %c0_i32, %c0_i32_0 : i32, i32
  }
  func.func @transform_26(%arg0: i32) -> (i32, i32) {
    %c0_i32 = arith.constant 0 : i32
    %c0_i32_0 = arith.constant 0 : i32
    %c0_i32_1 = arith.constant 0 : i32
    return %c0_i32, %c0_i32_0 : i32, i32
  }
  func.func @transform_27(%arg0: i32) -> (i32, i32, i32) {
    %c0_i32 = arith.constant 0 : i32
    %c0_i32_0 = arith.constant 0 : i32
    %c0_i32_1 = arith.constant 0 : i32
    return %arg0, %c0_i32, %c0_i32_0 : i32, i32, i32
  }
  func.func @transform_28(%arg0: i32) -> (i32, i32, i32) {
    %c0_i32 = arith.constant 0 : i32
    %c0_i32_0 = arith.constant 0 : i32
    %c0_i32_1 = arith.constant 0 : i32
    return %arg0, %c0_i32, %c0_i32_0 : i32, i32, i32
  }
  func.func @transform_29(%arg0: i32) -> (i32, i32, i32) {
    %c0_i32 = arith.constant 0 : i32
    %c0_i32_0 = arith.constant 0 : i32
    %c0_i32_1 = arith.constant 0 : i32
    return %arg0, %c0_i32, %c0_i32_0 : i32, i32, i32
  }
  func.func @transform_30(%arg0: i32) -> (i32, i32, i32) {
    %c0_i32 = arith.constant 0 : i32
    %c0_i32_0 = arith.constant 0 : i32
    %c0_i32_1 = arith.constant 0 : i32
    return %arg0, %c0_i32, %c0_i32_0 : i32, i32, i32
  }
  func.func @transform_31(%arg0: i32) -> (i32, i32, i32) {
    %c0_i32 = arith.constant 0 : i32
    %c0_i32_0 = arith.constant 0 : i32
    %c0_i32_1 = arith.constant 0 : i32
    return %arg0, %c0_i32, %c0_i32_0 : i32, i32, i32
  }
}

</mosaic_0001>

<bundles_post_ra>
// kernel: gbblock_forward.1
= control target key start
LH: loop header
LB: loop body
LE: loop exit
PB: predicated region body
PF: predicated region fallthrough
CT: control target
= control target key end

     0   :  { %s5083_s6 = smov 1   ;;  %s5084_s10 = smov 2   ;;  %s5624_s0 = inlined_call_operand.smem [shape: u32[32], index: -1, kind: input, shape index: {}] }
   0x1   :  { %s5124_s5 = sld [smem:[%s5624_s0]]   ;;  %s5085_s14 = smov 3  }
   0x2   :  { %s5129_s9 = sld [smem:[%s5624_s0 + %s5083_s6]]   ;;  %s5086_s18 = smov 4  }
   0x3   :  { %s5134_s13 = sld [smem:[%s5624_s0 + %s5084_s10]]   ;;  %s5087_s22 = smov 5  }
   0x4   :  { %s5139_s17 = sld [smem:[%s5624_s0 + %s5085_s14]]   ;;  %s5088_s26 = smov 6  }
   0x5   :  { %s5144_s21 = sld [smem:[%s5624_s0 + %s5086_s18]]   ;;  %s5089_s30 = smov 7  }
   0x6   :  { %s5149_s25 = sld [smem:[%s5624_s0 + %s5087_s22]]   ;;  %s5090_s4 = smov 8  }
   0x7   :  { %s5154_s29 = sld [smem:[%s5624_s0 + %s5088_s26]]   ;;  %s5091_s10 = smov 9  }
   0x8   :  { %s5159_s3 = sld [smem:[%s5624_s0 + %s5089_s30]]   ;;  %s5092_s15 = smov 10  }
   0x9   :  { %s5164_s8 = sld [smem:[%s5624_s0 + %s5090_s4]]   ;;  %s5093_s20 = smov 11  }
   0xa   :  { %s5169_s14 = sld [smem:[%s5624_s0 + %s5091_s10]]   ;;  %s5094_s26 = smov 12  }
   0xb   :  { %s5174_s19 = sld [smem:[%s5624_s0 + %s5092_s15]]   ;;  %s5095_s1 = smov 13  }
   0xc   :  { %s5179_s24 = sld [smem:[%s5624_s0 + %s5093_s20]]   ;;  %s5096_s7 = smov 14  }
   0xd   :  { %s5184_s30 = sld [smem:[%s5624_s0 + %s5094_s26]]   ;;  %s5097_s15 = smov 15  }
   0xe   :  { %s5189_s6 = sld [smem:[%s5624_s0 + %s5095_s1]]   ;;  %s5098_s22 = smov 16  }
   0xf   :  { %s5194_s12 = sld [smem:[%s5624_s0 + %s5096_s7]]   ;;  %s5099_s28 = smov 17  }
  0x10   :  { %s5199_s20 = sld [smem:[%s5624_s0 + %s5097_s15]]   ;;  %s5100_s7 = smov 18  }
  0x11   :  { %s5204_s27 = sld [smem:[%s5624_s0 + %s5098_s22]]   ;;  %s5101_s15 = smov 19  }
  0x12   :  { %s5209_s4 = sld [smem:[%s5624_s0 + %s5099_s28]]   ;;  %s5102_s22 = smov 20  }
  0x13   :  { %s5103_s28 = smov 21  }
  0x14   :  { %5632 = sst [smem:[#allocation2_spill]] %s5189_s6 }
  0x15   :  { %5633 = sst [smem:[#allocation3_spill]] %s5194_s12 }
  0x16   :  { %5634 = sst [smem:[#allocation4_spill]] %s5199_s20 }
  0x17   :  { %5635 = sst [smem:[#allocation5_spill]] %s5204_s27 }
  0x18   :  { %5636 = sst [smem:[#allocation6_spill]] %s5209_s4 }
  0x19   :  { %s5214_s12 = sld [smem:[%s5624_s0 + %s5100_s7]]   ;;  %s5104_s7 = smov 22  }
  0x1a   :  { %s5219_s20 = sld [smem:[%s5624_s0 + %s5101_s15]]   ;;  %s5105_s15 = smov 23  }
  0x1b   :  { %s5224_s27 = sld [smem:[%s5624_s0 + %s5102_s22]]   ;;  %s5106_s22 = smov 24  }
  0x1c   :  { %s5229_s4 = sld [smem:[%s5624_s0 + %s5103_s28]]   ;;  %s5107_s28 = smov 25  }
  0x1f   :  { %5637 = sst [smem:[#allocation7_spill]] %s5214_s12 }
  0x20   :  { %5638 = sst [smem:[#allocation8_spill]] %s5219_s20 }
  0x21   :  { %5639 = sst [smem:[#allocation9_spill]] %s5224_s27 }
  0x22   :  { %5640 = sst [smem:[#allocation10_spill]] %s5229_s4 }
  0x23   :  { %s5234_s12 = sld [smem:[%s5624_s0 + %s5104_s7]]   ;;  %s5108_s7 = smov 26  }
  0x24   :  { %s5239_s20 = sld [smem:[%s5624_s0 + %s5105_s15]]   ;;  %s5109_s15 = smov 27  }
  0x25   :  { %s5244_s27 = sld [smem:[%s5624_s0 + %s5106_s22]]   ;;  %s5110_s22 = smov 28  }
  0x26   :  { %s5249_s4 = sld [smem:[%s5624_s0 + %s5107_s28]]   ;;  %s5111_s28 = smov 29  }
  0x29   :  { %5641 = sst [smem:[#allocation11_spill]] %s5234_s12 }
  0x2a   :  { %5642 = sst [smem:[#allocation12_spill]] %s5239_s20 }
  0x2b   :  { %5643 = sst [smem:[#allocation13_spill]] %s5244_s27 }
  0x2c   :  { %5644 = sst [smem:[#allocation14_spill]] %s5249_s4 }
  0x2d   :  { %s5254_s12 = sld [smem:[%s5624_s0 + %s5108_s7]]   ;;  %s5112_s7 = smov 30  }
  0x2e   :  { %s5259_s20 = sld [smem:[%s5624_s0 + %s5109_s15]]   ;;  %s5113_s15 = smov 31  }
  0x2f   :  { %s5264_s27 = sld [smem:[%s5624_s0 + %s5110_s22]]   ;;  %s5281_s22 = smov 0  }
  0x30   :  { %s5269_s4 = sld [smem:[%s5624_s0 + %s5111_s28]]  }
  0x31   :  { %s5279_s6 = sld [smem:[%s5624_s0 + %s5113_s15]]  }
  0x33   :  { %5645 = sst [smem:[#allocation15_spill]] %s5254_s12 }
  0x34   :  { %s5274_s12 = sld [smem:[%s5624_s0 + %s5112_s7]]  }
  0x35 LB: > { %s4222_s23 = sadd.s32 4294967295, %s5081_s22   ;;  %p4226_p0 = scmp.ge.s32.totalorder %s5081_s22, 1  ;;  %s5081_s22 = sphi %s5281_s22, %s74_s22  }
  0x36   : > { %p878_p1 = scmp.lt.s32.totalorder %s5081_s22, 3 }
  0x38   : > { %p879_p2 = pnand %p4226_p0, %p878_p1 }
  0x39   : > { %p977_p3 = scmp.lt.s32.totalorder (!%p879_p2), %s4222_s23, 1  ;;  %s5646_s10 = sld [smem:[#allocation2_spill]] (!%p879_p2) }
  0x3a   : > { %882 = sbr.rel (%p879_p2) target bundleno = 2795 (0xaeb), region = 128  ;;  %s5647_s11 = sld [smem:[#allocation7_spill]] (!%p879_p2) }
  0x3b   : > { %s5648_s15 = sld [smem:[#allocation3_spill]] (!%p879_p2) }
  0x3c   : > { %s5649_s16 = sld [smem:[#allocation4_spill]] (!%p879_p2) }
  0x3f   : > { %v4742_v0 = vld [vmem:[%s5129_s9 + $0x74] ss:$8 sps:$4 sm:$0xff]   ;;  %v4746_v2 = vld [vmem:[%s5129_s9 + $0x70] ss:$8 sps:$4 sm:$0xff]   ;;  %v4748_v4 = vld [vmem:[%s5129_s9 + $0x64] ss:$8 sps:$4 sm:$0xff]  }
  0x40   : > { %v4744_v1 = vld [vmem:[%s5129_s9 + $0x174] ss:$8 sps:$4 sm:$0xff]   ;;  %1462 = vmatprep.subr.bf16.mxu0 %v4742_v0  ;;  %v4747_v3 = vld [vmem:[%s5129_s9 + $0x170] ss:$8 sps:$4 sm:$0xff]   ;;  %v4750_v5 = vld [vmem:[%s5129_s9 + $0x164] ss:$8 sps:$4 sm:$0xff]  }
  0x41   : > { %1505 = vmatprep.subr.bf16.mxu1 %v4744_v1  ;;  %1463 = vmatpush1.bf16.msra.mxu0 %v4746_v2  ;;  %v4752_v6 = vld [vmem:[%s5129_s9 + $0x60] ss:$8 sps:$4 sm:$0xff]   ;;  %v4754_v8 = vld [vmem:[%s5129_s9 + $0x54] ss:$8 sps:$4 sm:$0xff]   ;;  %v4758_v10 = vld [vmem:[%s5129_s9 + $0x50] ss:$8 sps:$4 sm:$0xff]  }
  0x42   : > { %1506 = vmatpush1.bf16.msra.mxu1 %v4747_v3  ;;  %1464 = vmatprep.subr.bf16.mxu0 %v4748_v4  ;;  %v4753_v7 = vld [vmem:[%s5129_s9 + $0x160] ss:$8 sps:$4 sm:$0xff]   ;;  %v4756_v9 = vld [vmem:[%s5129_s9 + $0x154] ss:$8 sps:$4 sm:$0xff]   ;;  %v4759_v11 = vld [vmem:[%s5129_s9 + $0x150] ss:$8 sps:$4 sm:$0xff]  }
  0x43   : > { %1507 = vmatprep.subr.bf16.mxu1 %v4750_v5  ;;  %v4760_v12 = vld [vmem:[%s5129_s9 + $0x44] ss:$8 sps:$4 sm:$0xff]   ;;  %v4764_v14 = vld [vmem:[%s5129_s9 + $0x40] ss:$8 sps:$4 sm:$0xff]   ;;  %v4766_v16 = vld [vmem:[%s5129_s9 + $0x34] ss:$8 sps:$4 sm:$0xff]  }
  0x44   : > { %v4762_v13 = vld [vmem:[%s5129_s9 + $0x144] ss:$8 sps:$4 sm:$0xff]   ;;  %v4765_v15 = vld [vmem:[%s5129_s9 + $0x140] ss:$8 sps:$4 sm:$0xff]   ;;  %v4768_v17 = vld [vmem:[%s5129_s9 + $0x134] ss:$8 sps:$4 sm:$0xff]  }
  0x45   : > { %1465 = vmatpush1.bf16.msra.mxu0 %v4752_v6  ;;  %v4770_v18 = vld [vmem:[%s5129_s9 + $0x30] ss:$8 sps:$4 sm:$0xff]   ;;  %v4772_v20 = vld [vmem:[%s5129_s9 + $0x24] ss:$8 sps:$4 sm:$0xff]   ;;  %v4776_v22 = vld [vmem:[%s5129_s9 + $0x20] ss:$8 sps:$4 sm:$0xff]  }
  0x46   : > { %1508 = vmatpush1.bf16.msra.mxu1 %v4753_v7  ;;  %1466 = vmatprep.subr.bf16.mxu0 %v4754_v8  ;;  %v4771_v19 = vld [vmem:[%s5129_s9 + $0x130] ss:$8 sps:$4 sm:$0xff]   ;;  %v4774_v21 = vld [vmem:[%s5129_s9 + $0x124] ss:$8 sps:$4 sm:$0xff]   ;;  %v4777_v23 = vld [vmem:[%s5129_s9 + $0x120] ss:$8 sps:$4 sm:$0xff]  }
  0x47   : > { %1509 = vmatprep.subr.bf16.mxu1 %v4756_v9  ;;  %v4778_v24 = vld [vmem:[%s5129_s9 + $0x14] ss:$8 sps:$4 sm:$0xff]   ;;  %v4782_v26 = vld [vmem:[%s5129_s9 + $0x10] ss:$8 sps:$4 sm:$0xff]   ;;  %v4784_v28 = vld [vmem:[%s5129_s9 + $0x4] ss:$8 sps:$4 sm:$0xff]  }
  0x48   : > { %v4780_v25 = vld [vmem:[%s5129_s9 + $0x114] ss:$8 sps:$4 sm:$0xff]   ;;  %v4783_v27 = vld [vmem:[%s5129_s9 + $0x110] ss:$8 sps:$4 sm:$0xff]   ;;  %v4786_v29 = vld [vmem:[%s5129_s9 + $0x104] ss:$8 sps:$4 sm:$0xff]  }
  0x49   : > { %1467 = vmatpush1.bf16.msra.mxu0 %v4758_v10  ;;  %v4788_v30 = vld [vmem:[%s5129_s9] ss:$8 sps:$4 sm:$0xff]   ;;  %v4790_v32 = vld [vmem:[%s5129_s9 + $0xf4] ss:$8 sps:$4 sm:$0xff]   ;;  %v4794_v34 = vld [vmem:[%s5129_s9 + $0xf0] ss:$8 sps:$4 sm:$0xff]   ;;  %v1083_v10 = vlaneseq }
  0x4a   : > { %1510 = vmatpush1.bf16.msra.mxu1 %v4759_v11  ;;  %1468 = vmatprep.subr.bf16.mxu0 %v4760_v12  ;;  %v4789_v31 = vld [vmem:[%s5129_s9 + $0x100] ss:$8 sps:$4 sm:$0xff]   ;;  %v4792_v33 = vld [vmem:[%s5129_s9 + $0x1f4] ss:$8 sps:$4 sm:$0xff]   ;;  %v4795_v35 = vld [vmem:[%s5129_s9 + $0x1f0] ss:$8 sps:$4 sm:$0xff]  }
  0x4b   : > { %1511 = vmatprep.subr.bf16.mxu1 %v4762_v13  ;;  %v4796_v36 = vld [vmem:[%s5129_s9 + $0xe4] ss:$8 sps:$4 sm:$0xff]   ;;  %s5661_s23 = smov (!%p977_p3, %s4222_s23), 1  ;;  %v4800_v38 = vld [vmem:[%s5129_s9 + $0xe0] ss:$8 sps:$4 sm:$0xff]   ;;  %v5114_v8 = vmov 0  }
  0x4c   : > { %v4798_v37 = vld [vmem:[%s5129_s9 + $0x1e4] ss:$8 sps:$4 sm:$0xff]   ;;  %v4801_v39 = vld [vmem:[%s5129_s9 + $0x1e0] ss:$8 sps:$4 sm:$0xff]   ;;  %v4802_v40 = vld [vmem:[%s5129_s9 + $0xd4] ss:$8 sps:$4 sm:$0xff]  }
  0x4d   : > { %1469 = vmatpush1.bf16.msra.mxu0 %v4764_v14  ;;  %s4700_s0 = smul.u32 40, %s5661_s23  ;;  %v4804_v41 = vld [vmem:[%s5129_s9 + $0x1d4] ss:$8 sps:$4 sm:$0xff]   ;;  %v4806_v42 = vld [vmem:[%s5129_s9 + $0xd0] ss:$8 sps:$4 sm:$0xff]   ;;  %vm1458_vm0 = vcmask 261120  }
  0x4e   : > { %1512 = vmatpush1.bf16.msra.mxu1 %v4765_v15  ;;  %1470 = vmatprep.subr.bf16.mxu0 %v4766_v16  ;;  %v4807_v43 = vld [vmem:[%s5129_s9 + $0x1d0] ss:$8 sps:$4 sm:$0xff]   ;;  %v4808_v44 = vld [vmem:[%s5129_s9 + $0xc4] ss:$8 sps:$4 sm:$0xff]   ;;  %v4812_v46 = vld [vmem:[%s5129_s9 + $0xc0] ss:$8 sps:$4 sm:$0xff]  }
  0x4f   : > { %1513 = vmatprep.subr.bf16.mxu1 %v4768_v17  ;;  %s5342_s26 = scalar_lea.vmem %s5124_s5, %s4700_s0  ;;  %v4810_v45 = vld [vmem:[%s5129_s9 + $0x1c4] ss:$8 sps:$4 sm:$0xff]   ;;  %v4813_v47 = vld [vmem:[%s5129_s9 + $0x1c0] ss:$8 sps:$4 sm:$0xff]   ;;  %v4814_v48 = vld [vmem:[%s5129_s9 + $0xb4] ss:$8 sps:$4 sm:$0xff]  }
  0x50   : > { %v4840_v49 = vld [vmem:[%s5342_s26 + $0x4] ss:$20 sps:$4 sm:$0xff]   ;;  %v4816_v50 = vld [vmem:[%s5129_s9 + $0x1b4] ss:$8 sps:$4 sm:$0xff]   ;;  %v4843_v51 = vld [vmem:[%s5342_s26 + $0xc] ss:$20 sps:$4 sm:$0xff]  }
  0x51   : > { %1471 = vmatpush1.bf16.msra.mxu0 %v4770_v18  ;;  %1494 = vmatprep.mubr.bf16.mxu0 %v4840_v49  ;;  %v4818_v52 = vld [vmem:[%s5129_s9 + $0xb0] ss:$8 sps:$4 sm:$0xff]   ;;  %v4820_v54 = vld [vmem:[%s5129_s9 + $0xa4] ss:$8 sps:$4 sm:$0xff]   ;;  %v4824_v56 = vld [vmem:[%s5129_s9 + $0xa0] ss:$8 sps:$4 sm:$0xff]  }
  0x52   : > { %1514 = vmatpush1.bf16.msra.mxu1 %v4771_v19  ;;  %1472 = vmatprep.subr.bf16.mxu0 %v4772_v20  ;;  %v4819_v53 = vld [vmem:[%s5129_s9 + $0x1b0] ss:$8 sps:$4 sm:$0xff]   ;;  %v4822_v55 = vld [vmem:[%s5129_s9 + $0x1a4] ss:$8 sps:$4 sm:$0xff]   ;;  %v4825_v57 = vld [vmem:[%s5129_s9 + $0x1a0] ss:$8 sps:$4 sm:$0xff]  }
  0x53   : > { %1515 = vmatprep.subr.bf16.mxu1 %v4774_v21  ;;  %1537 = vmatprep.mubr.bf16.mxu1 %v4843_v51  ;;  %v4826_v58 = vld [vmem:[%s5129_s9 + $0x94] ss:$8 sps:$4 sm:$0xff]   ;;  %v4830_v60 = vld [vmem:[%s5129_s9 + $0x90] ss:$8 sps:$4 sm:$0xff]   ;;  %v4832_v62 = vld [vmem:[%s5129_s9 + $0x84] ss:$8 sps:$4 sm:$0xff]  }
  0x54   : > { %v4828_v59 = vld [vmem:[%s5129_s9 + $0x194] ss:$8 sps:$4 sm:$0xff]   ;;  %v4831_v61 = vld [vmem:[%s5129_s9 + $0x190] ss:$8 sps:$4 sm:$0xff]   ;;  %v4834_v63 = vld [vmem:[%s5129_s9 + $0x184] ss:$8 sps:$4 sm:$0xff]  }
  0x55   : > { %1473 = vmatpush1.bf16.msra.mxu0 %v4776_v22  ;;  %v4836_v0 = vld [vmem:[%s5129_s9 + $0x80] ss:$8 sps:$4 sm:$0xff]   ;;  %v4846_v2 = vld [vmem:[%s5129_s9 + $0x214] ss:$8 sps:$4 sm:$0xff]   ;;  %v4844_v5 = vld [vmem:[%s5129_s9 + $0x210] ss:$8 sps:$4 sm:$0xff]  }
  0x56   : > { %1516 = vmatpush1.bf16.msra.mxu1 %v4777_v23  ;;  %1474 = vmatprep.subr.bf16.mxu0 %v4778_v24  ;;  %v4837_v1 = vld [vmem:[%s5129_s9 + $0x180] ss:$8 sps:$4 sm:$0xff]   ;;  %v4849_v6 = vld [vmem:[%s5129_s9 + $0x204] ss:$8 sps:$4 sm:$0xff]   ;;  %v5376_v11 = vshrl.u32 %v1083_v10, 7  ;;  %s4520_s28 = sshll.u32 %s5661_s23, 5 }
  0x57   : > { %1517 = vmatprep.subr.bf16.mxu1 %v4780_v25  ;;  %v4838_v3 = vld [vmem:[%s5342_s26] ss:$20 sps:$4 sm:$0xff]   ;;  %v4841_v4 = vld [vmem:[%s5342_s26 + $0x8] ss:$20 sps:$4 sm:$0xff]   ;;  %v4850_v9 = vld [vmem:[%s5342_s26 + $0x10] ss:$20 sps:$4 sm:$0xff]   ;;  %s986_s1 = scalar_lea.vmem %s5259_s20, %s4520_s28 }
  0x58   : > { %v4847_v7 = vld [vmem:[%s5129_s9 + $0x200] ss:$8 sps:$4 sm:$0xff]   ;;  %v5379_v12 = vsub.s32 0, %v5376_v11  ;;  %v5383_v14 = vsub.s32 1, %v5376_v11  ;;  %vm1602_vm1 = vcmask 130048   ;;  %v4853_v51 = vld [vmem:[%s5149_s25 + $0x38] sm:$0xff]  }
  0x59   : > { %1475 = vmatpush1.bf16.msra.mxu0 %v4782_v26  ;;  %v1081_v13 = vld [vmem:[%s5134_s13] sm:$0x3]  ;;  %s4521_s2 = sshll.u32 %s5661_s23, 4  ;;  %vm2194_vm2 = vcmask 1043456   ;;  %vm2190_vm3 = vcmask 64512   ;;  %s4522_s18 = sshll.u32 %s5661_s23, 3 }
  0x5a   : > { %1518 = vmatpush1.bf16.msra.mxu1 %v4783_v27  ;;  %1476 = vmatprep.subr.bf16.mxu0 %v4784_v28  ;;  %v1086_v15 = vrot.slane %v1081_v13, %v5379_v12  ;;  %v1090_v18 = vrot.slane %v1081_v13, %v5383_v14  ;;  %v1601_v49 = vld [vmem:[%s5139_s17] sm:$0xf]  ;;  %v4875_v13 = vld [vmem:[%s5149_s25 + $0x48] sm:$0xff]   ;;  %s991_s7 = scalar_lea.vmem %s5264_s27, %s4521_s2  ;;  %s5650_s0 = sld [smem:[#allocation6_spill]]  ;;  %vm2792_vm4 = vcmask 1041408   ;;  %vm2788_vm5 = vcmask 31744  }
  0x5b   : > { %1519 = vmatprep.subr.bf16.mxu1 %v4786_v29  ;;  %s996_s26 = scalar_lea.vmem %s5269_s4, %s4522_s18  ;;  %s5651_s28 = sld [smem:[#allocation5_spill]]  ;;  %vm3397_vm6 = vcmask 1040384   ;;  %vm3393_vm7 = vcmask 15360   ;;  %vm4003_vm8 = vcmp.lt.s32.totalorder %v1083_v10, 256 }
  0x5c   : > { %s5653_s2 = sld [smem:[#allocation13_spill]] }
  0x5d   : > { %1477 = vmatpush1.bf16.msra.mxu0 %v4788_v30  ;;  %s5656_s18 = sld [smem:[#allocation12_spill]] }
  0x5e   : > { %1520 = vmatpush1.bf16.msra.mxu1 %v4789_v31  ;;  %1478 = vmatprep.subr.bf16.mxu0 %v4790_v32 }
  0x5f   : > { %1521 = vmatprep.subr.bf16.mxu1 %v4792_v33 }
  0x61   : > { %1479 = vmatpush2.bf16.msra.mxu0 %v4794_v34 }
  0x62   : > { %1522 = vmatpush2.bf16.msra.mxu1 %v4795_v35  ;;  %1480 = vmatprep.subr.bf16.mxu0 %v4796_v36 }
  0x63   : > { %1523 = vmatprep.subr.bf16.mxu1 %v4798_v37 }
  0x65   : > { %1481 = vmatpush2.bf16.msra.mxu0 %v4800_v38 }
  0x66   : > { %1524 = vmatpush2.bf16.msra.mxu1 %v4801_v39  ;;  %1482 = vmatprep.subr.bf16.mxu0 %v4802_v40 }
  0x67   : > { %1525 = vmatprep.subr.bf16.mxu1 %v4804_v41 }
  0x69   : > { %1483 = vmatpush2.bf16.msra.mxu0 %v4806_v42 }
  0x6a   : > { %1526 = vmatpush2.bf16.msra.mxu1 %v4807_v43  ;;  %1484 = vmatprep.subr.bf16.mxu0 %v4808_v44 }
  0x6b   : > { %1527 = vmatprep.subr.bf16.mxu1 %v4810_v45 }
  0x6d   : > { %1485 = vmatpush2.bf16.msra.mxu0 %v4812_v46  ;;  %v4851_v46 = vld [vmem:[%s5149_s25 + $0x78] sm:$0xff]  }
  0x6e   : > { %1528 = vmatpush2.bf16.msra.mxu1 %v4813_v47  ;;  %1486 = vmatprep.subr.bf16.mxu0 %v4814_v48  ;;  %v4852_v47 = vld [vmem:[%s5154_s29 + $0x78] sm:$0xff]  }
  0x6f   : > { %1529 = vmatprep.subr.bf16.mxu1 %v4816_v50  ;;  %v1647_v50 = vld [vmem:[%s5144_s21] sm:$0xf] }
  0x71   : > { %1487 = vmatpush2.bf16.msra.mxu0 %v4818_v52  ;;  %v4854_v52 = vld [vmem:[%s5154_s29 + $0x38] sm:$0xff]  }
  0x72   : > { %1530 = vmatpush2.bf16.msra.mxu1 %v4819_v53  ;;  %1488 = vmatprep.subr.bf16.mxu0 %v4820_v54  ;;  %v4855_v53 = vld [vmem:[%s5149_s25 + $0x70] sm:$0xff]  }
  0x73   : > { %1531 = vmatprep.subr.bf16.mxu1 %v4822_v55  ;;  %v4856_v54 = vld [vmem:[%s5154_s29 + $0x70] sm:$0xff]  }
  0x74   : > { %v4857_v55 = vld [vmem:[%s5149_s25 + $0x30] sm:$0xff]  }
  0x75   : > { %1489 = vmatpush2.bf16.msra.mxu0 %v4824_v56  ;;  %v4858_v56 = vld [vmem:[%s5154_s29 + $0x30] sm:$0xff]  }
  0x76   : > { %1532 = vmatpush2.bf16.msra.mxu1 %v4825_v57  ;;  %1490 = vmatprep.subr.bf16.mxu0 %v4826_v58  ;;  %v4859_v57 = vld [vmem:[%s5149_s25 + $0x68] sm:$0xff]  }
  0x77   : > { %1533 = vmatprep.subr.bf16.mxu1 %v4828_v59  ;;  %v4860_v58 = vld [vmem:[%s5154_s29 + $0x68] sm:$0xff]  }
  0x78   : > { %v4861_v59 = vld [vmem:[%s5149_s25 + $0x28] sm:$0xff]  }
  0x79   : > { %1491 = vmatpush2.bf16.msra.mxu0 %v4830_v60  ;;  %v4862_v60 = vld [vmem:[%s5154_s29 + $0x28] sm:$0xff]  }
  0x7a   : > { %1534 = vmatpush2.bf16.msra.mxu1 %v4831_v61  ;;  %1492 = vmatprep.subr.bf16.mxu0 %v4832_v62  ;;  %v4863_v61 = vld [vmem:[%s5149_s25 + $0x60] sm:$0xff]  }
  0x7b   : > { %1535 = vmatprep.subr.bf16.mxu1 %v4834_v63  ;;  %v4864_v62 = vld [vmem:[%s5154_s29 + $0x60] sm:$0xff]  }
  0x7c   : > { %v4865_v63 = vld [vmem:[%s5149_s25 + $0x20] sm:$0xff]  }
  0x7d   : > { %1493 = vmatpush2.bf16.msra.mxu0 %v4836_v0  ;;  %v4866_v0 = vld [vmem:[%s5154_s29 + $0x20] sm:$0xff]  }
  0x7e   : > { %1536 = vmatpush2.bf16.msra.mxu1 %v4837_v1  ;;  %v4867_v1 = vld [vmem:[%s5149_s25 + $0x58] sm:$0xff]  }
  0x7f   : > { %1560 = vmatprep.subr.bf16.mxu1 %v4846_v2  ;;  %v4868_v2 = vld [vmem:[%s5154_s29 + $0x58] sm:$0xff]  }
  0x80   : > { %1495 = vmatmul.mubr.bf16.vlgmr.msra.gmra.mxu0 %v4838_v3  ;;  %v4869_v3 = vld [vmem:[%s5149_s25 + $0x18] sm:$0xff]  }
  0x81   : > { %1538 = vmatmul.mubr.bf16.vlgmr.msra.gmra.mxu1 %v4841_v4  ;;  %1683 = vmatprep.mubr.bf16.mxu0 %v5114_v8  ;;  %v4870_v4 = vld [vmem:[%s5154_s29 + $0x18] sm:$0xff]  }
  0x82   : > { %1561 = vmatpush1.bf16.msra.mxu1 %v4844_v5  ;;  %1580 = vmatprep.mubr.bf16.mxu1 %v5114_v8  ;;  %v4871_v5 = vld [vmem:[%s5149_s25 + $0x50] sm:$0xff]  }
  0x83   : > { %1562 = vmatprep.subr.bf16.mxu1 %v4849_v6  ;;  %v4872_v6 = vld [vmem:[%s5154_s29 + $0x50] sm:$0xff]  }
  0x86   : > { %1563 = vmatpush1.bf16.msra.mxu1 %v4847_v7  ;;  %v4873_v7 = vld [vmem:[%s5149_s25 + $0x10] sm:$0xff]  }
  0x89   : > { %4310 = vmatmul.mubr.msk.bf16.vlgmr.msra.gmra.mxu1 %vm1458_vm0, %v4850_v9  ;;  %v4874_v9 = vld [vmem:[%s5154_s29 + $0x10] sm:$0xff]  }
  0x8a   : > { %1638 = vmatprep.mubr.bf16.mxu1 %v5114_v8 }
 0x140   : > { %v1496_v16 = vpop.f32.mrf.mxu0 }
 0x141   : > { %v1539_v17 = vpop.f32.mrf.mxu1  ;;  %v1497_v21 = vadd.f32 %v1496_v16, %v1086_v15  ;;  %v4877_v16 = vld [vmem:[%s5149_s25 + $0x8] sm:$0xff]  }
 0x142   : > { %v1498_v19 = vpop.f32.mrf.mxu0 }
 0x143   : > { %v1541_v20 = vpop.f32.mrf.mxu1  ;;  %v1499_v24 = vadd.f32 %v1498_v19, %v1090_v18  ;;  %v1540_v27 = vadd.f32 %v1539_v17, %v1497_v21  ;;  %v4878_v17 = vld [vmem:[%s5154_s29 + $0x8] sm:$0xff]   ;;  %v4880_v19 = vld [vmem:[%s5154_s29 + $0x40] sm:$0xff]  }
 0x144   : > { %v1500_v22 = vpop.f32.mrf.mxu0  ;;  %v4882_v21 = vld [vmem:[%s5154_s29] sm:$0xff]  }
 0x145   : > { %v1543_v23 = vpop.f32.mrf.mxu1  ;;  %v1501_v28 = vadd.f32 %v1500_v22, %v1086_v15  ;;  %v1542_v30 = vadd.f32 %v1541_v20, %v1499_v24  ;;  %v4876_v15 = vld [vmem:[%s5154_s29 + $0x48] sm:$0xff]   ;;  %v4881_v20 = vld [vmem:[%s5149_s25] sm:$0xff]   ;;  %v4885_v22 = vld [vmem:[%s5159_s3 + $0x74] ss:$8 sps:$4 sm:$0xff]  }
 0x146   : > { %v1502_v25 = vpop.f32.mrf.mxu0 }
 0x147   : > { %v1545_v26 = vpop.f32.mrf.mxu1  ;;  %v1503_v31 = vadd.f32 %v1502_v25, %v1090_v18  ;;  %v1544_v34 = vadd.f32 %v1543_v23, %v1501_v28  ;;  %v4879_v18 = vld [vmem:[%s5149_s25 + $0x40] sm:$0xff]  }
 0x149   : > { %v1582_v29 = vpop.f32.mrf.mxu1  ;;  %v1546_v38 = vadd.f32 %v1545_v26, %v1503_v31 }
 0x14a   : > { %v1583_v32 = vadd.f32 %v1582_v29, %v1540_v27 }
 0x14b   : > { %v1584_v33 = vpop.f32.mrf.mxu1 }
 0x14c   : > { %v1591_v35 = vmax.f32 %v1583_v32, 0.0  ;;  %v1585_v36 = vadd.f32 %v1584_v33, %v1542_v30  ;;  %v4883_v32 = vld [vmem:[%s5159_s3 + $0x70] ss:$8 sps:$4 sm:$0xff]  }
 0x14d   : > { %v1586_v37 = vpop.f32.mrf.mxu1 }
 0x14e   : > { %1595 = vst [vmem:[%s986_s1] sm:$0xff] %v1591_v35  ;;  %v1592_v39 = vmax.f32 %v1585_v36, 0.0  ;;  %v1587_v40 = vadd.f32 %v1586_v37, %v1544_v34  ;;  %v4888_v36 = vld [vmem:[%s5159_s3 + $0x64] ss:$8 sps:$4 sm:$0xff]   ;;  %v4886_v37 = vld [vmem:[%s5159_s3 + $0x60] ss:$8 sps:$4 sm:$0xff]  }
 0x14f   : > { %v1588_v41 = vpop.f32.mrf.mxu1 }
 0x150   : > { %1596 = vst [vmem:[%s986_s1 + $0x8] sm:$0xff] %v1592_v39  ;;  %v1593_v42 = vmax.f32 %v1587_v40, 0.0  ;;  %v1589_v43 = vadd.f32 %v1588_v41, %v1546_v38  ;;  %v4891_v38 = vld [vmem:[%s5159_s3 + $0x54] ss:$8 sps:$4 sm:$0xff]   ;;  %v4894_v40 = vld [vmem:[%s5159_s3 + $0x44] ss:$8 sps:$4 sm:$0xff]  }
 0x151   : > { %v4892_v41 = vld [vmem:[%s5159_s3 + $0x40] ss:$8 sps:$4 sm:$0xff]  }
 0x152   : > { %1597 = vst [vmem:[%s986_s1 + $0x10] sm:$0xff] %v1593_v42  ;;  %v1594_v44 = vmax.f32 %v1589_v43, 0.0  ;;  %v1599_v48 = vpack.c.bf16 %v1593_v42, %v1591_v35  ;;  %v4897_v42 = vld [vmem:[%s5159_s3 + $0x34] ss:$8 sps:$4 sm:$0xff]   ;;  %v4895_v43 = vld [vmem:[%s5159_s3 + $0x30] ss:$8 sps:$4 sm:$0xff]  }
 0x154   : > { %1598 = vst [vmem:[%s986_s1 + $0x18] sm:$0xff] %v1594_v44  ;;  %v1600_v45 = vpack.c.bf16 %v1594_v44, %v1592_v39  ;;  %v4889_v39 = vld [vmem:[%s5159_s3 + $0x50] ss:$8 sps:$4 sm:$0xff]   ;;  %v4900_v44 = vld [vmem:[%s5159_s3 + $0x24] ss:$8 sps:$4 sm:$0xff]   ;;  %s5652_s1 = sld [smem:[#allocation8_spill]] }
 0x156   : > { %1620 = vmatprep.subr.bf16.mxu1 %v1600_v45  ;;  %1665 = vmatprep.subr.bf16.mxu0 %v1600_v45  ;;  %v4898_v45 = vld [vmem:[%s5159_s3 + $0x20] ss:$8 sps:$4 sm:$0xff]  }
 0x157   : > { %1621 = vmatpush1.bf16.msra.mxu1 %v1599_v48  ;;  %1666 = vmatpush1.bf16.msra.mxu0 %v1599_v48  ;;  %v4906_v48 = vld [vmem:[%s5159_s3 + $0x4] ss:$8 sps:$4 sm:$0xff]  }
 0x158   : > { %4524 = vmatprep.subr.bf16.mxu1 %v4851_v46  ;;  %4546 = vmatprep.subr.bf16.mxu0 %v4852_v47  ;;  %v4903_v46 = vld [vmem:[%s5159_s3 + $0x14] ss:$8 sps:$4 sm:$0xff]   ;;  %v4901_v47 = vld [vmem:[%s5159_s3 + $0x10] ss:$8 sps:$4 sm:$0xff]  }
 0x15a   : > { %4311 = vmatmul.mubr.msk.bf16.vlgmr.msra.gmra.mxu1 %vm1602_vm1, %v1601_v49  ;;  %4312 = vmatmul.mubr.msk.bf16.vlgmr.msra.gmra.mxu0 %vm1602_vm1, %v1647_v50  ;;  %v4904_v49 = vld [vmem:[%s5159_s3] ss:$8 sps:$4 sm:$0xff]  }
 0x15b   : > { %4525 = vmatpush3.bf16.msra.mxu1 %v4853_v51  ;;  %4547 = vmatpush3.bf16.msra.mxu0 %v4854_v52 }
 0x15c   : > { %4526 = vmatprep.subr.bf16.mxu1 %v4855_v53  ;;  %4548 = vmatprep.subr.bf16.mxu0 %v4856_v54 }
 0x15f   : > { %4527 = vmatpush3.bf16.msra.mxu1 %v4857_v55  ;;  %4549 = vmatpush3.bf16.msra.mxu0 %v4858_v56 }
 0x160   : > { %4528 = vmatprep.subr.bf16.mxu1 %v4859_v57  ;;  %4550 = vmatprep.subr.bf16.mxu0 %v4860_v58 }
 0x163   : > { %4529 = vmatpush3.bf16.msra.mxu1 %v4861_v59  ;;  %4551 = vmatpush3.bf16.msra.mxu0 %v4862_v60 }
 0x164   : > { %4530 = vmatprep.subr.bf16.mxu1 %v4863_v61  ;;  %4552 = vmatprep.subr.bf16.mxu0 %v4864_v62  ;;  %v4908_v62 = vld [vmem:[%s5184_s30 + $0x78] sm:$0xff]  }
 0x167   : > { %4531 = vmatpush3.bf16.msra.mxu1 %v4865_v63  ;;  %4553 = vmatpush3.bf16.msra.mxu0 %v4866_v0  ;;  %v4910_v63 = vld [vmem:[%s5184_s30 + $0x38] sm:$0xff]   ;;  %v4912_v0 = vld [vmem:[%s5184_s30 + $0x70] sm:$0xff]  }
 0x168   : > { %4532 = vmatprep.subr.bf16.mxu1 %v4867_v1  ;;  %4554 = vmatprep.subr.bf16.mxu0 %v4868_v2  ;;  %v4914_v1 = vld [vmem:[%s5184_s30 + $0x30] sm:$0xff]   ;;  %v4916_v2 = vld [vmem:[%s5184_s30 + $0x68] sm:$0xff]  }
 0x16b   : > { %4533 = vmatpush3.bf16.msra.mxu1 %v4869_v3  ;;  %4555 = vmatpush3.bf16.msra.mxu0 %v4870_v4  ;;  %v4918_v3 = vld [vmem:[%s5184_s30 + $0x28] sm:$0xff]   ;;  %v4920_v4 = vld [vmem:[%s5184_s30 + $0x60] sm:$0xff]  }
 0x16c   : > { %4534 = vmatprep.subr.bf16.mxu1 %v4871_v5  ;;  %4556 = vmatprep.subr.bf16.mxu0 %v4872_v6  ;;  %v4922_v5 = vld [vmem:[%s5184_s30 + $0x20] sm:$0xff]  }
 0x16d   : > { %v2050_v6 = vld [vmem:[%s5164_s8] sm:$0x3] }
 0x16f   : > { %4535 = vmatpush3.bf16.msra.mxu1 %v4873_v7  ;;  %4557 = vmatpush3.bf16.msra.mxu0 %v4874_v9  ;;  %v2055_v7 = vrot.slane %v2050_v6, %v5379_v12  ;;  %v2059_v9 = vrot.slane %v2050_v6, %v5383_v14  ;;  %v4948_v6 = vld [vmem:[%s5646_s10 + $0x40] ss:$8 sps:$4 sm:$0xff]  }
 0x170   : > { %4536 = vmatprep.subr.bf16.mxu1 %v4875_v13  ;;  %4558 = vmatprep.subr.bf16.mxu0 %v4876_v15 }
 0x173   : > { %4537 = vmatpush3.bf16.msra.mxu1 %v4877_v16  ;;  %4559 = vmatpush3.bf16.msra.mxu0 %v4878_v17 }
 0x174   : > { %4538 = vmatprep.subr.bf16.mxu1 %v4879_v18  ;;  %4560 = vmatprep.subr.bf16.mxu0 %v4880_v19 }
 0x177   : > { %4539 = vmatpush3.bf16.msra.mxu1 %v4881_v20  ;;  %4561 = vmatpush3.bf16.msra.mxu0 %v4882_v21 }
 0x178   : > { %2142 = vmatprep.subr.bf16.mxu1 %v4885_v22 }
 0x21a   : > { %v1640_v23 = vpop.f32.mrf.mxu1  ;;  %v1685_v24 = vpop.f32.mrf.mxu0 }
 0x21b   : > { %v1692_v25 = vmax.f32 %v1640_v23, %v1685_v24 }
 0x21c   : > { %v1642_v26 = vpop.f32.mrf.mxu1  ;;  %v1687_v27 = vpop.f32.mrf.mxu0 }
 0x21d   : > { %v1693_v28 = vmax.f32 %v1642_v26, %v1687_v27  ;;  %v1694_v33 = vpack.c.bf16 %v1692_v25, %v1692_v25  ;;  %v2189_v25 = vld [vmem:[%s5169_s14] sm:$0x3]  ;;  %v4907_v26 = vld [vmem:[%s5179_s24 + $0x78] sm:$0xff]  }
 0x21e   : > { %v1644_v29 = vpop.f32.mrf.mxu1  ;;  %v1689_v30 = vpop.f32.mrf.mxu0  ;;  %v2242_v27 = vld [vmem:[%s5174_s19] sm:$0x3] }
 0x21f   : > { %v1695_v31 = vpack.c.bf16 %v1693_v28, %v1693_v28  ;;  %v4909_v28 = vld [vmem:[%s5179_s24 + $0x38] sm:$0xff]   ;;  %v4911_v29 = vld [vmem:[%s5179_s24 + $0x70] sm:$0xff]  }
 0x220   : > { %v1645_v34 = vpop.f32.mrf.mxu1  ;;  %v1690_v35 = vpop.f32.mrf.mxu0  ;;  %v4913_v30 = vld [vmem:[%s5179_s24 + $0x30] sm:$0xff]  }
 0x221   : > { %1856 = vmatprep.mubr.bf16.mxu1 %v1695_v31  ;;  %2024 = vmatprep.mubr.bf16.mxu0 %v1695_v31  ;;  %v4915_v31 = vld [vmem:[%s5179_s24 + $0x68] sm:$0xff]   ;;  %v4921_v34 = vld [vmem:[%s5179_s24 + $0x20] sm:$0xff]   ;;  %v4923_v35 = vld [vmem:[%s5179_s24 + $0x58] sm:$0xff]  }
 0x222   : > { %1857 = vmatmul.mubr.bf16.vlgmr.msra.gmra.mxu1 %v1694_v33  ;;  %2025 = vmatmul.mubr.bf16.vlgmr.msra.gmra.mxu0 %v1694_v33  ;;  %v4919_v33 = vld [vmem:[%s5179_s24 + $0x60] sm:$0xff]  }
 0x223   : > { %2143 = vmatpush1.bf16.msra.mxu1 %v4883_v32  ;;  %2174 = vmatprep.mubr.bf16.mxu1 %v5114_v8  ;;  %v4917_v32 = vld [vmem:[%s5179_s24 + $0x28] sm:$0xff]  }
 0x224   : > { %2144 = vmatprep.subr.bf16.mxu1 %v4888_v36  ;;  %2233 = vmatprep.mubr.bf16.mxu0 %v5114_v8  ;;  %v4924_v36 = vld [vmem:[%s5184_s30 + $0x58] sm:$0xff]  }
 0x227   : > { %2145 = vmatpush1.bf16.msra.mxu1 %v4886_v37  ;;  %v4925_v37 = vld [vmem:[%s5179_s24 + $0x18] sm:$0xff]  }
 0x228   : > { %2146 = vmatprep.subr.bf16.mxu1 %v4891_v38  ;;  %v4926_v38 = vld [vmem:[%s5184_s30 + $0x18] sm:$0xff]  }
 0x22b   : > { %2147 = vmatpush1.bf16.msra.mxu1 %v4889_v39  ;;  %v4927_v39 = vld [vmem:[%s5179_s24 + $0x50] sm:$0xff]  }
 0x22c   : > { %2148 = vmatprep.subr.bf16.mxu1 %v4894_v40  ;;  %v4928_v40 = vld [vmem:[%s5184_s30 + $0x50] sm:$0xff]  }
 0x22f   : > { %2149 = vmatpush1.bf16.msra.mxu1 %v4892_v41  ;;  %v4929_v41 = vld [vmem:[%s5179_s24 + $0x10] sm:$0xff]  }
 0x230   : > { %2150 = vmatprep.subr.bf16.mxu1 %v4897_v42  ;;  %v4930_v42 = vld [vmem:[%s5184_s30 + $0x10] sm:$0xff]  }
 0x233   : > { %2151 = vmatpush1.bf16.msra.mxu1 %v4895_v43  ;;  %v4931_v43 = vld [vmem:[%s5179_s24 + $0x48] sm:$0xff]  }
 0x234   : > { %2152 = vmatprep.subr.bf16.mxu1 %v4900_v44  ;;  %v4932_v44 = vld [vmem:[%s5184_s30 + $0x48] sm:$0xff]  }
 0x237   : > { %2153 = vmatpush1.bf16.msra.mxu1 %v4898_v45  ;;  %v4933_v45 = vld [vmem:[%s5179_s24 + $0x8] sm:$0xff]  }
 0x238   : > { %2154 = vmatprep.subr.bf16.mxu1 %v4903_v46  ;;  %v4934_v46 = vld [vmem:[%s5184_s30 + $0x8] sm:$0xff]  }
 0x23b   : > { %2155 = vmatpush1.bf16.msra.mxu1 %v4901_v47  ;;  %v4935_v47 = vld [vmem:[%s5179_s24 + $0x40] sm:$0xff]  }
 0x23c   : > { %2156 = vmatprep.subr.bf16.mxu1 %v4906_v48  ;;  %v4936_v48 = vld [vmem:[%s5184_s30 + $0x40] sm:$0xff]  }
 0x23f   : > { %2157 = vmatpush1.bf16.msra.mxu1 %v4904_v49  ;;  %v4937_v49 = vld [vmem:[%s5179_s24] sm:$0xff]  }
 0x240   : > { %4590 = vmatprep.subr.bf16.mxu1 %v4908_v62  ;;  %v4939_v62 = vld [vmem:[%s5646_s10 + $0x70] ss:$8 sps:$4 sm:$0xff]  }
 0x2e2   : > { %v4540_v50 = vpop.f32.mrf.mxu1  ;;  %v4562_v51 = vpop.f32.mrf.mxu0 }
 0x2e4   : > { %v4541_v52 = vpop.f32.mrf.mxu1  ;;  %v4563_v53 = vpop.f32.mrf.mxu0 }
 0x2e5   : > { %v4542_v54 = vadd.f32 %v4541_v52, %v4540_v50  ;;  %v4564_v55 = vadd.f32 %v4563_v53, %v4562_v51  ;;  %v4938_v50 = vld [vmem:[%s5184_s30] sm:$0xff]   ;;  %v4941_v51 = vld [vmem:[%s5646_s10 + $0x74] ss:$8 sps:$4 sm:$0xff]  }
 0x2e6   : > { %v4543_v56 = vpop.f32.mrf.mxu1  ;;  %v4565_v57 = vpop.f32.mrf.mxu0 }
 0x2e7   : > { %v2032_v58 = vmax.f32 %v4542_v54, %v4564_v55 }
 0x2e8   : > { %v4544_v59 = vpop.f32.mrf.mxu1  ;;  %v4566_v60 = vpop.f32.mrf.mxu0 }
 0x2e9   : > { %v2033_v61 = vpack.c.bf16 %v2032_v58, %v2032_v58 }
 0x2eb   : > { %2175 = vmatmul.mubr.bf16.vlgmr.msra.gmra.mxu1 %v2033_v61 }
 0x2ec   : > { %4591 = vmatpush3.bf16.msra.mxu1 %v4910_v63 }
 0x2ed   : > { %4592 = vmatprep.subr.bf16.mxu1 %v4912_v0 }
 0x2f0   : > { %4593 = vmatpush3.bf16.msra.mxu1 %v4914_v1  ;;  %v4944_v1 = vld [vmem:[%s5646_s10 + $0x64] ss:$8 sps:$4 sm:$0xff]  }
 0x2f1   : > { %4594 = vmatprep.subr.bf16.mxu1 %v4916_v2  ;;  %v4942_v2 = vld [vmem:[%s5646_s10 + $0x60] ss:$8 sps:$4 sm:$0xff]  }
 0x2f4   : > { %4595 = vmatpush3.bf16.msra.mxu1 %v4918_v3  ;;  %v4947_v3 = vld [vmem:[%s5646_s10 + $0x54] ss:$8 sps:$4 sm:$0xff]  }
 0x2f5   : > { %4596 = vmatprep.subr.bf16.mxu1 %v4920_v4  ;;  %v4945_v4 = vld [vmem:[%s5646_s10 + $0x50] ss:$8 sps:$4 sm:$0xff]  }
 0x2f8   : > { %4597 = vmatpush3.bf16.msra.mxu1 %v4922_v5  ;;  %v4950_v5 = vld [vmem:[%s5646_s10 + $0x44] ss:$8 sps:$4 sm:$0xff]  }
 0x2f9   : > { %4598 = vmatprep.subr.bf16.mxu1 %v4924_v36  ;;  %v4972_v36 = vld [vmem:[%s5647_s11 + $0x68] sm:$0xff]  }
 0x2fc   : > { %4599 = vmatpush3.bf16.msra.mxu1 %v4926_v38  ;;  %v4976_v38 = vld [vmem:[%s5647_s11 + $0x60] sm:$0xff]  }
 0x2fd   : > { %4600 = vmatprep.subr.bf16.mxu1 %v4928_v40  ;;  %v2645_v40 = vld [vmem:[%s5648_s15] sm:$0x3]  ;;  %s5655_s15 = sld [smem:[#allocation10_spill]] }
 0x300   : > { %4601 = vmatpush3.bf16.msra.mxu1 %v4930_v42  ;;  %v2654_v42 = vrot.slane %v2645_v40, %v5383_v14 }
 0x301   : > { %4602 = vmatprep.subr.bf16.mxu1 %v4932_v44 }
 0x304   : > { %4603 = vmatpush3.bf16.msra.mxu1 %v4934_v46 }
 0x305   : > { %4604 = vmatprep.subr.bf16.mxu1 %v4936_v48 }
 0x308   : > { %4605 = vmatpush3.bf16.msra.mxu1 %v4938_v50 }
 0x3ab   : > { %v2176_v13 = vpop.f32.mrf.mxu1 }
 0x3ac   : > { %v2177_v15 = vadd.f32 %v2176_v13, %v2055_v7  ;;  %v4953_v7 = vld [vmem:[%s5646_s10 + $0x34] ss:$8 sps:$4 sm:$0xff]   ;;  %v4956_v13 = vld [vmem:[%s5646_s10 + $0x24] ss:$8 sps:$4 sm:$0xff]  }
 0x3ad   : > { %v2178_v16 = vpop.f32.mrf.mxu1 }
 0x3ae   : > { %v2183_v17 = vmax.f32 %v2177_v15, 0.0  ;;  %v2179_v18 = vadd.f32 %v2178_v16, %v2059_v9  ;;  %v4951_v9 = vld [vmem:[%s5646_s10 + $0x30] ss:$8 sps:$4 sm:$0xff]   ;;  %v4954_v15 = vld [vmem:[%s5646_s10 + $0x20] ss:$8 sps:$4 sm:$0xff]  }
 0x3af   : > { %v2180_v19 = vpop.f32.mrf.mxu1  ;;  %v4959_v16 = vld [vmem:[%s5646_s10 + $0x14] ss:$8 sps:$4 sm:$0xff]  }
 0x3b0   : > { %2185 = vst [vmem:[%s991_s7] sm:$0xff] %v2183_v17  ;;  %v2187_v20 = vpack.c.bf16 %v2183_v17, %v2183_v17  ;;  %v2184_v21 = vmax.f32 %v2179_v18, 0.0  ;;  %v4957_v17 = vld [vmem:[%s5646_s10 + $0x10] ss:$8 sps:$4 sm:$0xff]   ;;  %v4962_v18 = vld [vmem:[%s5646_s10 + $0x4] ss:$8 sps:$4 sm:$0xff]  }
 0x3b1   : > { %v2181_v22 = vpop.f32.mrf.mxu1  ;;  %v4960_v19 = vld [vmem:[%s5646_s10] ss:$8 sps:$4 sm:$0xff]  }
 0x3b2   : > { %2186 = vst [vmem:[%s991_s7 + $0x8] sm:$0xff] %v2184_v21  ;;  %v2188_v23 = vpack.c.bf16 %v2184_v21, %v2184_v21  ;;  %v2196_v24 = vsel %vm2194_vm2, %v2187_v20, 0  ;;  %s5654_s7 = sld [smem:[#allocation9_spill]] }
 0x3b4   : > { %4361 = vmatprep.subr.msk.bf16.mxu0 %vm2194_vm2, %v2188_v23 }
 0x3b5   : > { %2216 = vmatpush1.bf16.msra.mxu0 %v2196_v24 }
 0x3b6   : > { %4363 = vmatprep.subr.msk.bf16.mxu0 %vm2194_vm2, %v2188_v23 }
 0x3b8   : > { %4362 = vmatmul.mubr.msk.bf16.vlgmr.msra.gmra.mxu0 %vm2190_vm3, %v2189_v25 }
 0x3b9   : > { %2261 = vmatpush1.bf16.msra.mxu0 %v2196_v24  ;;  %2278 = vmatprep.mubr.bf16.mxu0 %v5114_v8 }
 0x3ba   : > { %4568 = vmatprep.subr.bf16.mxu0 %v4907_v26 }
 0x3c0   : > { %4364 = vmatmul.mubr.msk.bf16.vlgmr.msra.gmra.mxu0 %vm2190_vm3, %v2242_v27 }
 0x3c1   : > { %4569 = vmatpush3.bf16.msra.mxu0 %v4909_v28 }
 0x3c2   : > { %4570 = vmatprep.subr.bf16.mxu0 %v4911_v29 }
 0x3c5   : > { %4571 = vmatpush3.bf16.msra.mxu0 %v4913_v30 }
 0x3c6   : > { %4572 = vmatprep.subr.bf16.mxu0 %v4915_v31 }
 0x3c9   : > { %4573 = vmatpush3.bf16.msra.mxu0 %v4917_v32  ;;  %v4964_v32 = vld [vmem:[%s5647_s11 + $0x78] sm:$0xff]  }
 0x3ca   : > { %4574 = vmatprep.subr.bf16.mxu0 %v4919_v33  ;;  %v4966_v33 = vld [vmem:[%s5647_s11 + $0x38] sm:$0xff]  }
 0x3cd   : > { %4575 = vmatpush3.bf16.msra.mxu0 %v4921_v34  ;;  %v4968_v34 = vld [vmem:[%s5647_s11 + $0x70] sm:$0xff]  }
 0x3ce   : > { %4576 = vmatprep.subr.bf16.mxu0 %v4923_v35  ;;  %v4970_v35 = vld [vmem:[%s5647_s11 + $0x30] sm:$0xff]  }
 0x3d1   : > { %4577 = vmatpush3.bf16.msra.mxu0 %v4925_v37  ;;  %v4974_v37 = vld [vmem:[%s5647_s11 + $0x28] sm:$0xff]  }
 0x3d2   : > { %4578 = vmatprep.subr.bf16.mxu0 %v4927_v39  ;;  %v4978_v39 = vld [vmem:[%s5647_s11 + $0x20] sm:$0xff]  }
 0x3d5   : > { %4579 = vmatpush3.bf16.msra.mxu0 %v4929_v41  ;;  %v2650_v41 = vrot.slane %v2645_v40, %v5379_v12  ;;  %v5006_v40 = vld [vmem:[%s5652_s1 + $0x44] ss:$8 sps:$4 sm:$0xff]  }
 0x3d6   : > { %4580 = vmatprep.subr.bf16.mxu0 %v4931_v43 }
 0x3d9   : > { %4581 = vmatpush3.bf16.msra.mxu0 %v4933_v45 }
 0x3da   : > { %4582 = vmatprep.subr.bf16.mxu0 %v4935_v47 }
 0x3dd   : > { %4583 = vmatpush3.bf16.msra.mxu0 %v4937_v49 }
 0x3de   : > { %2737 = vmatprep.subr.bf16.mxu0 %v4941_v51 }
 0x478   : > { %v2235_v52 = vpop.f32.mrf.mxu0 }
 0x47a   : > { %v2237_v53 = vpop.f32.mrf.mxu0 }
 0x47c   : > { %v2239_v54 = vpop.f32.mrf.mxu0 }
 0x47e   : > { %v2240_v55 = vpop.f32.mrf.mxu0 }
 0x47f   : > { %v2787_v55 = vld [vmem:[%s5649_s16] sm:$0x1]  ;;  %s4523_s16 = sshll.u32 %s5661_s23, 2 }
 0x480   : > { %v2280_v56 = vpop.f32.mrf.mxu0 }
 0x481   : > { %v2287_v57 = vmax.f32 %v2235_v52, %v2280_v56  ;;  %v4963_v56 = vld [vmem:[%s5650_s0 + $0x78] sm:$0xff]  }
 0x482   : > { %v2282_v58 = vpop.f32.mrf.mxu0 }
 0x483   : > { %v2288_v59 = vmax.f32 %v2237_v53, %v2282_v58  ;;  %v2289_v63 = vpack.c.bf16 %v2287_v57, %v2287_v57  ;;  %v2840_v57 = vld [vmem:[%s5651_s28] sm:$0x1]  ;;  %v4965_v58 = vld [vmem:[%s5650_s0 + $0x38] sm:$0xff]   ;;  %s5657_s28 = sld [smem:[#allocation11_spill]] }
 0x484   : > { %v2284_v60 = vpop.f32.mrf.mxu0 }
 0x485   : > { %v2290_v61 = vpack.c.bf16 %v2288_v59, %v2288_v59  ;;  %v4967_v59 = vld [vmem:[%s5650_s0 + $0x70] sm:$0xff]  }
 0x486   : > { %v2285_v0 = vpop.f32.mrf.mxu0  ;;  %v4969_v60 = vld [vmem:[%s5650_s0 + $0x30] sm:$0xff]  }
 0x487   : > { %2451 = vmatprep.mubr.bf16.mxu0 %v2290_v61  ;;  %2619 = vmatprep.mubr.bf16.mxu1 %v2290_v61  ;;  %v4971_v61 = vld [vmem:[%s5650_s0 + $0x68] sm:$0xff]   ;;  %v4977_v0 = vld [vmem:[%s5650_s0 + $0x20] sm:$0xff]  }
 0x488   : > { %2452 = vmatmul.mubr.bf16.vlgmr.msra.gmra.mxu0 %v2289_v63  ;;  %2620 = vmatmul.mubr.bf16.vlgmr.msra.gmra.mxu1 %v2289_v63  ;;  %v4975_v63 = vld [vmem:[%s5650_s0 + $0x60] sm:$0xff]  }
 0x489   : > { %2738 = vmatpush1.bf16.msra.mxu0 %v4939_v62  ;;  %2769 = vmatprep.mubr.bf16.mxu0 %v5114_v8  ;;  %v4973_v62 = vld [vmem:[%s5650_s0 + $0x28] sm:$0xff]  }
 0x48a   : > { %2739 = vmatprep.subr.bf16.mxu0 %v4944_v1  ;;  %2831 = vmatprep.mubr.bf16.mxu1 %v5114_v8  ;;  %v4979_v1 = vld [vmem:[%s5650_s0 + $0x58] sm:$0xff]  }
 0x48d   : > { %2740 = vmatpush1.bf16.msra.mxu0 %v4942_v2  ;;  %v4980_v2 = vld [vmem:[%s5647_s11 + $0x58] sm:$0xff]  }
 0x48e   : > { %2741 = vmatprep.subr.bf16.mxu0 %v4947_v3  ;;  %v4981_v3 = vld [vmem:[%s5650_s0 + $0x18] sm:$0xff]  }
 0x491   : > { %2742 = vmatpush1.bf16.msra.mxu0 %v4945_v4  ;;  %v4982_v4 = vld [vmem:[%s5647_s11 + $0x18] sm:$0xff]  }
 0x492   : > { %2743 = vmatprep.subr.bf16.mxu0 %v4950_v5  ;;  %v4983_v5 = vld [vmem:[%s5650_s0 + $0x50] sm:$0xff]  }
 0x495   : > { %2744 = vmatpush1.bf16.msra.mxu0 %v4948_v6  ;;  %v4984_v6 = vld [vmem:[%s5647_s11 + $0x50] sm:$0xff]  }
 0x496   : > { %2745 = vmatprep.subr.bf16.mxu0 %v4953_v7  ;;  %v4985_v7 = vld [vmem:[%s5650_s0 + $0x10] sm:$0xff]  }
 0x499   : > { %2746 = vmatpush1.bf16.msra.mxu0 %v4951_v9  ;;  %v4986_v9 = vld [vmem:[%s5647_s11 + $0x10] sm:$0xff]  }
 0x49a   : > { %2747 = vmatprep.subr.bf16.mxu0 %v4956_v13  ;;  %v4987_v13 = vld [vmem:[%s5650_s0 + $0x48] sm:$0xff]  }
 0x49d   : > { %2748 = vmatpush1.bf16.msra.mxu0 %v4954_v15  ;;  %v4988_v15 = vld [vmem:[%s5647_s11 + $0x48] sm:$0xff]  }
 0x49e   : > { %2749 = vmatprep.subr.bf16.mxu0 %v4959_v16  ;;  %v4989_v16 = vld [vmem:[%s5650_s0 + $0x8] sm:$0xff]  }
 0x4a1   : > { %2750 = vmatpush1.bf16.msra.mxu0 %v4957_v17  ;;  %v4990_v17 = vld [vmem:[%s5647_s11 + $0x8] sm:$0xff]  }
 0x4a2   : > { %2751 = vmatprep.subr.bf16.mxu0 %v4962_v18  ;;  %v4991_v18 = vld [vmem:[%s5650_s0 + $0x40] sm:$0xff]  }
 0x4a5   : > { %2752 = vmatpush1.bf16.msra.mxu0 %v4960_v19  ;;  %v4992_v19 = vld [vmem:[%s5647_s11 + $0x40] sm:$0xff]  }
 0x4a6   : > { %4634 = vmatprep.subr.bf16.mxu0 %v4964_v32 }
 0x548   : > { %v4584_v20 = vpop.f32.mrf.mxu0  ;;  %v4606_v21 = vpop.f32.mrf.mxu1 }
 0x54a   : > { %v4585_v22 = vpop.f32.mrf.mxu0  ;;  %v4607_v23 = vpop.f32.mrf.mxu1 }
 0x54b   : > { %v4586_v24 = vadd.f32 %v4585_v22, %v4584_v20  ;;  %v4608_v25 = vadd.f32 %v4607_v23, %v4606_v21  ;;  %v4993_v20 = vld [vmem:[%s5650_s0] sm:$0xff]   ;;  %v4997_v22 = vld [vmem:[%s5652_s1 + $0x74] ss:$8 sps:$4 sm:$0xff]  }
 0x54c   : > { %v4587_v26 = vpop.f32.mrf.mxu0  ;;  %v4609_v27 = vpop.f32.mrf.mxu1  ;;  %v4994_v21 = vld [vmem:[%s5647_s11] sm:$0xff]  }
 0x54d   : > { %v2627_v28 = vmax.f32 %v4586_v24, %v4608_v25 }
 0x54e   : > { %v4588_v29 = vpop.f32.mrf.mxu0  ;;  %v4610_v30 = vpop.f32.mrf.mxu1 }
 0x54f   : > { %v2628_v31 = vpack.c.bf16 %v2627_v28, %v2627_v28 }
 0x551   : > { %2770 = vmatmul.mubr.bf16.vlgmr.msra.gmra.mxu0 %v2628_v31 }
 0x552   : > { %4635 = vmatpush3.bf16.msra.mxu0 %v4966_v33  ;;  %v4995_v33 = vld [vmem:[%s5652_s1 + $0x70] ss:$8 sps:$4 sm:$0xff]  }
 0x553   : > { %4636 = vmatprep.subr.bf16.mxu0 %v4968_v34 }
 0x556   : > { %4637 = vmatpush3.bf16.msra.mxu0 %v4970_v35 }
 0x557   : > { %4638 = vmatprep.subr.bf16.mxu0 %v4972_v36  ;;  %v5000_v36 = vld [vmem:[%s5652_s1 + $0x64] ss:$8 sps:$4 sm:$0xff]  }
 0x55a   : > { %4639 = vmatpush3.bf16.msra.mxu0 %v4974_v37  ;;  %v4998_v37 = vld [vmem:[%s5652_s1 + $0x60] ss:$8 sps:$4 sm:$0xff]  }
 0x55b   : > { %4640 = vmatprep.subr.bf16.mxu0 %v4976_v38  ;;  %v5003_v38 = vld [vmem:[%s5652_s1 + $0x54] ss:$8 sps:$4 sm:$0xff]  }
 0x55e   : > { %4641 = vmatpush3.bf16.msra.mxu0 %v4978_v39  ;;  %v5001_v39 = vld [vmem:[%s5652_s1 + $0x50] ss:$8 sps:$4 sm:$0xff]  }
 0x55f   : > { %4642 = vmatprep.subr.bf16.mxu0 %v4980_v2  ;;  %v5028_v2 = vld [vmem:[%s5653_s2 + $0x68] sm:$0xff]  }
 0x562   : > { %4643 = vmatpush3.bf16.msra.mxu0 %v4982_v4  ;;  %v5032_v4 = vld [vmem:[%s5653_s2 + $0x60] sm:$0xff]  }
 0x563   : > { %4644 = vmatprep.subr.bf16.mxu0 %v4984_v6  ;;  %v3243_v6 = vld [vmem:[%s5654_s7] sm:$0x3]  ;;  %s5658_s7 = sld [smem:[#allocation14_spill]] }
 0x566   : > { %4645 = vmatpush3.bf16.msra.mxu0 %v4986_v9  ;;  %v3252_v9 = vrot.slane %v3243_v6, %v5383_v14 }
 0x567   : > { %4646 = vmatprep.subr.bf16.mxu0 %v4988_v15 }
 0x56a   : > { %4647 = vmatpush3.bf16.msra.mxu0 %v4990_v17 }
 0x56b   : > { %4648 = vmatprep.subr.bf16.mxu0 %v4992_v19 }
 0x56e   : > { %4649 = vmatpush3.bf16.msra.mxu0 %v4994_v21 }
 0x611   : > { %v2771_v43 = vpop.f32.mrf.mxu0 }
 0x612   : > { %v2772_v44 = vadd.f32 %v2771_v43, %v2650_v41  ;;  %v5004_v41 = vld [vmem:[%s5652_s1 + $0x40] ss:$8 sps:$4 sm:$0xff]   ;;  %v5007_v43 = vld [vmem:[%s5652_s1 + $0x30] ss:$8 sps:$4 sm:$0xff]  }
 0x613   : > { %v2773_v45 = vpop.f32.mrf.mxu0 }
 0x614   : > { %v2778_v46 = vmax.f32 %v2772_v44, 0.0  ;;  %v2774_v47 = vadd.f32 %v2773_v45, %v2654_v42  ;;  %v5009_v42 = vld [vmem:[%s5652_s1 + $0x34] ss:$8 sps:$4 sm:$0xff]   ;;  %v5012_v44 = vld [vmem:[%s5652_s1 + $0x24] ss:$8 sps:$4 sm:$0xff]  }
 0x615   : > { %v2775_v48 = vpop.f32.mrf.mxu0  ;;  %v5010_v45 = vld [vmem:[%s5652_s1 + $0x20] ss:$8 sps:$4 sm:$0xff]  }
 0x616   : > { %v2785_v49 = vpack.c.bf16 %v2778_v46, %v2778_v46  ;;  %v2779_v50 = vmax.f32 %v2774_v47, 0.0  ;;  %v5013_v47 = vld [vmem:[%s5652_s1 + $0x10] ss:$8 sps:$4 sm:$0xff]   ;;  %v5018_v48 = vld [vmem:[%s5652_s1 + $0x4] ss:$8 sps:$4 sm:$0xff]  }
 0x617   : > { %v2776_v51 = vpop.f32.mrf.mxu0 }
 0x618   : > { %v2782_v52 = vcombine.low %v2778_v46, %v2779_v50  ;;  %v2786_v53 = vpack.c.bf16 %v2779_v50, %v2779_v50  ;;  %v2794_v54 = vsel %vm2792_vm4, %v2785_v49, 0  ;;  %v5015_v46 = vld [vmem:[%s5652_s1 + $0x14] ss:$8 sps:$4 sm:$0xff]   ;;  %v5016_v49 = vld [vmem:[%s5652_s1] ss:$8 sps:$4 sm:$0xff]  }
 0x61a   : > { %2784 = vst [vmem:[%s996_s26] sm:$0xff] %v2782_v52  ;;  %4413 = vmatprep.subr.msk.bf16.mxu1 %vm2792_vm4, %v2786_v53  ;;  %s1001_s26 = scalar_lea.vmem %s5274_s12, %s4523_s16  ;;  %s4236_s16 = sshll.u32 %s5661_s23, 1 }
 0x61b   : > { %2814 = vmatpush1.bf16.msra.mxu1 %v2794_v54 }
 0x61c   : > { %4415 = vmatprep.subr.msk.bf16.mxu1 %vm2792_vm4, %v2786_v53 }
 0x61e   : > { %4414 = vmatmul.mubr.msk.bf16.vlgmr.msra.gmra.mxu1 %vm2788_vm5, %v2787_v55 }
 0x61f   : > { %2859 = vmatpush1.bf16.msra.mxu1 %v2794_v54  ;;  %2876 = vmatprep.mubr.bf16.mxu1 %v5114_v8 }
 0x620   : > { %4612 = vmatprep.subr.bf16.mxu1 %v4963_v56 }
 0x626   : > { %4416 = vmatmul.mubr.msk.bf16.vlgmr.msra.gmra.mxu1 %vm2788_vm5, %v2840_v57 }
 0x627   : > { %4613 = vmatpush3.bf16.msra.mxu1 %v4965_v58 }
 0x628   : > { %4614 = vmatprep.subr.bf16.mxu1 %v4967_v59 }
 0x62b   : > { %4615 = vmatpush3.bf16.msra.mxu1 %v4969_v60 }
 0x62c   : > { %4616 = vmatprep.subr.bf16.mxu1 %v4971_v61 }
 0x62f   : > { %4617 = vmatpush3.bf16.msra.mxu1 %v4973_v62  ;;  %v5020_v62 = vld [vmem:[%s5653_s2 + $0x78] sm:$0xff]  }
 0x630   : > { %4618 = vmatprep.subr.bf16.mxu1 %v4975_v63  ;;  %v5022_v63 = vld [vmem:[%s5653_s2 + $0x38] sm:$0xff]  }
 0x633   : > { %4619 = vmatpush3.bf16.msra.mxu1 %v4977_v0  ;;  %v5024_v0 = vld [vmem:[%s5653_s2 + $0x70] sm:$0xff]  }
 0x634   : > { %4620 = vmatprep.subr.bf16.mxu1 %v4979_v1  ;;  %v5026_v1 = vld [vmem:[%s5653_s2 + $0x30] sm:$0xff]  }
 0x637   : > { %4621 = vmatpush3.bf16.msra.mxu1 %v4981_v3  ;;  %v5030_v3 = vld [vmem:[%s5653_s2 + $0x28] sm:$0xff]  }
 0x638   : > { %4622 = vmatprep.subr.bf16.mxu1 %v4983_v5  ;;  %v5034_v5 = vld [vmem:[%s5653_s2 + $0x20] sm:$0xff]  }
 0x63b   : > { %4623 = vmatpush3.bf16.msra.mxu1 %v4985_v7  ;;  %v3248_v7 = vrot.slane %v3243_v6, %v5379_v12  ;;  %v5062_v6 = vld [vmem:[%s5658_s7 + $0x44] ss:$8 sps:$4 sm:$0xff]  }
 0x63c   : > { %4624 = vmatprep.subr.bf16.mxu1 %v4987_v13 }
 0x63f   : > { %4625 = vmatpush3.bf16.msra.mxu1 %v4989_v16 }
 0x640   : > { %4626 = vmatprep.subr.bf16.mxu1 %v4991_v18 }
 0x643   : > { %4627 = vmatpush3.bf16.msra.mxu1 %v4993_v20 }
 0x644   : > { %3335 = vmatprep.subr.bf16.mxu1 %v4997_v22 }
 0x6de   : > { %v2833_v23 = vpop.f32.mrf.mxu1 }
 0x6e0   : > { %v2835_v24 = vpop.f32.mrf.mxu1 }
 0x6e2   : > { %v2837_v25 = vpop.f32.mrf.mxu1 }
 0x6e4   : > { %v2838_v26 = vpop.f32.mrf.mxu1 }
 0x6e5   : > { %v3392_v26 = vld [vmem:[%s5655_s15] sm:$0x1]  ;;  %s5659_s15 = sld [smem:[#allocation15_spill]] }
 0x6e6   : > { %v2878_v27 = vpop.f32.mrf.mxu1 }
 0x6e7   : > { %v2885_v28 = vmax.f32 %v2833_v23, %v2878_v27  ;;  %v5019_v27 = vld [vmem:[%s5656_s18 + $0x78] sm:$0xff]  }
 0x6e8   : > { %v2880_v29 = vpop.f32.mrf.mxu1 }
 0x6e9   : > { %v2886_v30 = vmax.f32 %v2835_v24, %v2880_v29  ;;  %v2887_v34 = vpack.c.bf16 %v2885_v28, %v2885_v28  ;;  %v3445_v28 = vld [vmem:[%s5657_s28] sm:$0x1]  ;;  %v5021_v29 = vld [vmem:[%s5656_s18 + $0x38] sm:$0xff]  }
 0x6ea   : > { %v2882_v31 = vpop.f32.mrf.mxu1 }
 0x6eb   : > { %v2888_v32 = vpack.c.bf16 %v2886_v30, %v2886_v30  ;;  %v5023_v30 = vld [vmem:[%s5656_s18 + $0x70] sm:$0xff]  }
 0x6ec   : > { %v2883_v35 = vpop.f32.mrf.mxu1  ;;  %v5025_v31 = vld [vmem:[%s5656_s18 + $0x30] sm:$0xff]  }
 0x6ed   : > { %3049 = vmatprep.mubr.bf16.mxu1 %v2888_v32  ;;  %3217 = vmatprep.mubr.bf16.mxu0 %v2888_v32  ;;  %v5027_v32 = vld [vmem:[%s5656_s18 + $0x68] sm:$0xff]   ;;  %v5033_v35 = vld [vmem:[%s5656_s18 + $0x20] sm:$0xff]  }
 0x6ee   : > { %3050 = vmatmul.mubr.bf16.vlgmr.msra.gmra.mxu1 %v2887_v34  ;;  %3218 = vmatmul.mubr.bf16.vlgmr.msra.gmra.mxu0 %v2887_v34  ;;  %v5031_v34 = vld [vmem:[%s5656_s18 + $0x60] sm:$0xff]  }
 0x6ef   : > { %3336 = vmatpush1.bf16.msra.mxu1 %v4995_v33  ;;  %3367 = vmatprep.mubr.bf16.mxu1 %v5114_v8  ;;  %v5029_v33 = vld [vmem:[%s5656_s18 + $0x28] sm:$0xff]  }
 0x6f0   : > { %3337 = vmatprep.subr.bf16.mxu1 %v5000_v36  ;;  %3436 = vmatprep.mubr.bf16.mxu0 %v5114_v8  ;;  %v5035_v36 = vld [vmem:[%s5656_s18 + $0x58] sm:$0xff]  }
 0x6f3   : > { %3338 = vmatpush1.bf16.msra.mxu1 %v4998_v37  ;;  %v5036_v37 = vld [vmem:[%s5653_s2 + $0x58] sm:$0xff]  }
 0x6f4   : > { %3339 = vmatprep.subr.bf16.mxu1 %v5003_v38  ;;  %v5037_v38 = vld [vmem:[%s5656_s18 + $0x18] sm:$0xff]  }
 0x6f7   : > { %3340 = vmatpush1.bf16.msra.mxu1 %v5001_v39  ;;  %v5038_v39 = vld [vmem:[%s5653_s2 + $0x18] sm:$0xff]  }
 0x6f8   : > { %3341 = vmatprep.subr.bf16.mxu1 %v5006_v40  ;;  %v5039_v40 = vld [vmem:[%s5656_s18 + $0x50] sm:$0xff]  }
 0x6fb   : > { %3342 = vmatpush1.bf16.msra.mxu1 %v5004_v41  ;;  %v5040_v41 = vld [vmem:[%s5653_s2 + $0x50] sm:$0xff]  }
 0x6fc   : > { %3343 = vmatprep.subr.bf16.mxu1 %v5009_v42  ;;  %v5041_v42 = vld [vmem:[%s5656_s18 + $0x10] sm:$0xff]  }
 0x6ff   : > { %3344 = vmatpush1.bf16.msra.mxu1 %v5007_v43  ;;  %v5042_v43 = vld [vmem:[%s5653_s2 + $0x10] sm:$0xff]  }
 0x700   : > { %3345 = vmatprep.subr.bf16.mxu1 %v5012_v44  ;;  %v5043_v44 = vld [vmem:[%s5656_s18 + $0x48] sm:$0xff]  }
 0x703   : > { %3346 = vmatpush1.bf16.msra.mxu1 %v5010_v45  ;;  %v5044_v45 = vld [vmem:[%s5653_s2 + $0x48] sm:$0xff]  }
 0x704   : > { %3347 = vmatprep.subr.bf16.mxu1 %v5015_v46  ;;  %v5045_v46 = vld [vmem:[%s5656_s18 + $0x8] sm:$0xff]  }
 0x707   : > { %3348 = vmatpush1.bf16.msra.mxu1 %v5013_v47  ;;  %v5046_v47 = vld [vmem:[%s5653_s2 + $0x8] sm:$0xff]  }
 0x708   : > { %3349 = vmatprep.subr.bf16.mxu1 %v5018_v48  ;;  %v5047_v48 = vld [vmem:[%s5656_s18 + $0x40] sm:$0xff]  }
 0x70b   : > { %3350 = vmatpush1.bf16.msra.mxu1 %v5016_v49  ;;  %v5048_v49 = vld [vmem:[%s5653_s2 + $0x40] sm:$0xff]  }
 0x70c   : > { %4678 = vmatprep.subr.bf16.mxu1 %v5020_v62 }
 0x7ae   : > { %v4628_v50 = vpop.f32.mrf.mxu1  ;;  %v4650_v51 = vpop.f32.mrf.mxu0 }
 0x7b0   : > { %v4629_v52 = vpop.f32.mrf.mxu1  ;;  %v4651_v53 = vpop.f32.mrf.mxu0 }
 0x7b1   : > { %v4630_v54 = vadd.f32 %v4629_v52, %v4628_v50  ;;  %v4652_v55 = vadd.f32 %v4651_v53, %v4650_v51  ;;  %v5049_v50 = vld [vmem:[%s5656_s18] sm:$0xff]   ;;  %v5053_v52 = vld [vmem:[%s5658_s7 + $0x74] ss:$8 sps:$4 sm:$0xff]  }
 0x7b2   : > { %v4631_v56 = vpop.f32.mrf.mxu1  ;;  %v4653_v57 = vpop.f32.mrf.mxu0  ;;  %v5050_v51 = vld [vmem:[%s5653_s2] sm:$0xff]  }
 0x7b3   : > { %v3225_v58 = vmax.f32 %v4630_v54, %v4652_v55 }
 0x7b4   : > { %v4632_v59 = vpop.f32.mrf.mxu1  ;;  %v4654_v60 = vpop.f32.mrf.mxu0 }
 0x7b5   : > { %v3226_v61 = vpack.c.bf16 %v3225_v58, %v3225_v58 }
 0x7b7   : > { %3368 = vmatmul.mubr.bf16.vlgmr.msra.gmra.mxu1 %v3226_v61 }
 0x7b8   : > { %4679 = vmatpush3.bf16.msra.mxu1 %v5022_v63  ;;  %v5051_v63 = vld [vmem:[%s5658_s7 + $0x70] ss:$8 sps:$4 sm:$0xff]  }
 0x7b9   : > { %4680 = vmatprep.subr.bf16.mxu1 %v5024_v0 }
 0x7bc   : > { %4681 = vmatpush3.bf16.msra.mxu1 %v5026_v1 }
 0x7bd   : > { %4682 = vmatprep.subr.bf16.mxu1 %v5028_v2  ;;  %v5056_v2 = vld [vmem:[%s5658_s7 + $0x64] ss:$8 sps:$4 sm:$0xff]  }
 0x7c0   : > { %4683 = vmatpush3.bf16.msra.mxu1 %v5030_v3  ;;  %v5054_v3 = vld [vmem:[%s5658_s7 + $0x60] ss:$8 sps:$4 sm:$0xff]  }
 0x7c1   : > { %4684 = vmatprep.subr.bf16.mxu1 %v5032_v4  ;;  %v5059_v4 = vld [vmem:[%s5658_s7 + $0x54] ss:$8 sps:$4 sm:$0xff]  }
 0x7c4   : > { %4685 = vmatpush3.bf16.msra.mxu1 %v5034_v5  ;;  %v5057_v5 = vld [vmem:[%s5658_s7 + $0x50] ss:$8 sps:$4 sm:$0xff]  }
 0x7c5   : > { %4686 = vmatprep.subr.bf16.mxu1 %v5036_v37 }
 0x7c8   : > { %4687 = vmatpush3.bf16.msra.mxu1 %v5038_v39 }
 0x7c9   : > { %4688 = vmatprep.subr.bf16.mxu1 %v5040_v41 }
 0x7cc   : > { %4689 = vmatpush3.bf16.msra.mxu1 %v5042_v43 }
 0x7cd   : > { %4690 = vmatprep.subr.bf16.mxu1 %v5044_v45 }
 0x7d0   : > { %4691 = vmatpush3.bf16.msra.mxu1 %v5046_v47 }
 0x7d1   : > { %4692 = vmatprep.subr.bf16.mxu1 %v5048_v49 }
 0x7d4   : > { %4693 = vmatpush3.bf16.msra.mxu1 %v5050_v51 }
 0x877   : > { %v3369_v13 = vpop.f32.mrf.mxu1 }
 0x878   : > { %v3370_v15 = vadd.f32 %v3369_v13, %v3248_v7  ;;  %v5060_v7 = vld [vmem:[%s5658_s7 + $0x40] ss:$8 sps:$4 sm:$0xff]   ;;  %v5063_v13 = vld [vmem:[%s5658_s7 + $0x30] ss:$8 sps:$4 sm:$0xff]  }
 0x879   : > { %v3371_v16 = vpop.f32.mrf.mxu1 }
 0x87a   : > { %v3376_v17 = vmax.f32 %v3370_v15, 0.0  ;;  %v3372_v18 = vadd.f32 %v3371_v16, %v3252_v9  ;;  %v5065_v9 = vld [vmem:[%s5658_s7 + $0x34] ss:$8 sps:$4 sm:$0xff]   ;;  %v5068_v15 = vld [vmem:[%s5658_s7 + $0x24] ss:$8 sps:$4 sm:$0xff]  }
 0x87b   : > { %v3373_v19 = vpop.f32.mrf.mxu1  ;;  %v5071_v16 = vld [vmem:[%s5658_s7 + $0x14] ss:$8 sps:$4 sm:$0xff]  }
 0x87c   : > { %v3390_v20 = vpack.c.bf16 %v3376_v17, %v3376_v17  ;;  %v3377_v21 = vmax.f32 %v3372_v18, 0.0  ;;  %v5074_v18 = vld [vmem:[%s5658_s7 + $0x4] ss:$8 sps:$4 sm:$0xff]   ;;  %v5072_v19 = vld [vmem:[%s5658_s7] ss:$8 sps:$4 sm:$0xff]  }
 0x87d   : > { %v3374_v22 = vpop.f32.mrf.mxu1 }
 0x87e   : > { %v3380_v23 = vcombine.low %v3376_v17, %v3377_v21  ;;  %v3391_v24 = vpack.c.bf16 %v3377_v21, %v3377_v21  ;;  %v3399_v25 = vsel %vm3397_vm6, %v3390_v20, 0  ;;  %v5069_v17 = vld [vmem:[%s5658_s7 + $0x10] ss:$8 sps:$4 sm:$0xff]  }
 0x880   : > { %4465 = vst.sshfl [vmem:[%s1001_s26] sm:$0x33 pattern:$0x76325410] %v3380_v23  ;;  %4466 = vmatprep.subr.msk.bf16.mxu0 %vm3397_vm6, %v3391_v24  ;;  %s1005_s26 = scalar_lea.vmem %s5279_s6, %s4236_s16 }
 0x881   : > { %3419 = vmatpush1.bf16.msra.mxu0 %v3399_v25 }
 0x882   : > { %4468 = vmatprep.subr.msk.bf16.mxu0 %vm3397_vm6, %v3391_v24 }
 0x884   : > { %4467 = vmatmul.mubr.msk.bf16.vlgmr.msra.gmra.mxu0 %vm3393_vm7, %v3392_v26 }
 0x885   : > { %3464 = vmatpush1.bf16.msra.mxu0 %v3399_v25  ;;  %3481 = vmatprep.mubr.bf16.mxu0 %v5114_v8 }
 0x886   : > { %4656 = vmatprep.subr.bf16.mxu0 %v5019_v27 }
 0x88c   : > { %4469 = vmatmul.mubr.msk.bf16.vlgmr.msra.gmra.mxu0 %vm3393_vm7, %v3445_v28 }
 0x88d   : > { %4657 = vmatpush3.bf16.msra.mxu0 %v5021_v29 }
 0x88e   : > { %4658 = vmatprep.subr.bf16.mxu0 %v5023_v30 }
 0x891   : > { %4659 = vmatpush3.bf16.msra.mxu0 %v5025_v31 }
 0x892   : > { %4660 = vmatprep.subr.bf16.mxu0 %v5027_v32  ;;  %v3848_v32 = vld [vmem:[%s5659_s15] sm:$0x3] }
 0x895   : > { %4661 = vmatpush3.bf16.msra.mxu0 %v5029_v33  ;;  %v3933_v33 = vrot.slane %v3848_v32, %v5379_v12 }
 0x896   : > { %4662 = vmatprep.subr.bf16.mxu0 %v5031_v34  ;;  %v5115_v34 = vmov 1966171168  }
 0x899   : > { %4663 = vmatpush3.bf16.msra.mxu0 %v5033_v35  ;;  %v3987_v35 = vunpack.c.l.s4 %v5115_v34 }
 0x89a   : > { %4664 = vmatprep.subr.bf16.mxu0 %v5035_v36  ;;  %v3937_v36 = vrot.slane %v3848_v32, %v5383_v14 }
 0x89b   : > { %v3988_v39 = vunpack.c.0.s8 %v3987_v35 }
 0x89d   : > { %4665 = vmatpush3.bf16.msra.mxu0 %v5037_v38  ;;  %v3991_v45 = vsub.s32 %v3988_v39, %v5376_v11 }
 0x89e   : > { %4666 = vmatprep.subr.bf16.mxu0 %v5039_v40 }
 0x8a1   : > { %4667 = vmatpush3.bf16.msra.mxu0 %v5041_v42 }
 0x8a2   : > { %4668 = vmatprep.subr.bf16.mxu0 %v5043_v44 }
 0x8a5   : > { %4669 = vmatpush3.bf16.msra.mxu0 %v5045_v46 }
 0x8a6   : > { %4670 = vmatprep.subr.bf16.mxu0 %v5047_v48 }
 0x8a9   : > { %4671 = vmatpush3.bf16.msra.mxu0 %v5049_v50 }
 0x8aa   : > { %3940 = vmatprep.subr.bf16.mxu0 %v5053_v52 }
 0x944   : > { %v3438_v53 = vpop.f32.mrf.mxu0 }
 0x946   : > { %v3440_v54 = vpop.f32.mrf.mxu0 }
 0x948   : > { %v3442_v55 = vpop.f32.mrf.mxu0 }
 0x94a   : > { %v3443_v56 = vpop.f32.mrf.mxu0 }
 0x94c   : > { %v3483_v57 = vpop.f32.mrf.mxu0 }
 0x94d   : > { %v3490_v58 = vmax.f32 %v3438_v53, %v3483_v57 }
 0x94e   : > { %v3485_v59 = vpop.f32.mrf.mxu0 }
 0x94f   : > { %v3491_v60 = vmax.f32 %v3440_v54, %v3485_v59  ;;  %v3492_v0 = vpack.c.bf16 %v3490_v58, %v3490_v58 }
 0x950   : > { %v3487_v61 = vpop.f32.mrf.mxu0 }
 0x951   : > { %v3493_v62 = vpack.c.bf16 %v3491_v60, %v3491_v60 }
 0x952   : > { %v3488_v1 = vpop.f32.mrf.mxu0 }
 0x953   : > { %3654 = vmatprep.mubr.bf16.mxu0 %v3493_v62  ;;  %3822 = vmatprep.mubr.bf16.mxu1 %v3493_v62 }
 0x954   : > { %3655 = vmatmul.mubr.bf16.vlgmr.msra.gmra.mxu0 %v3492_v0  ;;  %3823 = vmatmul.mubr.bf16.vlgmr.msra.gmra.mxu1 %v3492_v0 }
 0x955   : > { %3941 = vmatpush1.bf16.msra.mxu0 %v5051_v63  ;;  %3972 = vmatprep.mubr.bf16.mxu0 %v5114_v8  ;;  %v5066_v8 = vld [vmem:[%s5658_s7 + $0x20] ss:$8 sps:$4 sm:$0xff]  }
 0x956   : > { %3942 = vmatprep.subr.bf16.mxu0 %v5056_v2 }
 0x959   : > { %3943 = vmatpush1.bf16.msra.mxu0 %v5054_v3 }
 0x95a   : > { %3944 = vmatprep.subr.bf16.mxu0 %v5059_v4 }
 0x95d   : > { %3945 = vmatpush1.bf16.msra.mxu0 %v5057_v5 }
 0x95e   : > { %3946 = vmatprep.subr.bf16.mxu0 %v5062_v6 }
 0x961   : > { %3947 = vmatpush1.bf16.msra.mxu0 %v5060_v7 }
 0x962   : > { %3948 = vmatprep.subr.bf16.mxu0 %v5065_v9 }
 0x965   : > { %3949 = vmatpush1.bf16.msra.mxu0 %v5063_v13 }
 0x966   : > { %3950 = vmatprep.subr.bf16.mxu0 %v5068_v15 }
 0x969   : > { %3951 = vmatpush1.bf16.msra.mxu0 %v5066_v8 }
 0x96a   : > { %3952 = vmatprep.subr.bf16.mxu0 %v5071_v16 }
 0x96d   : > { %3953 = vmatpush1.bf16.msra.mxu0 %v5069_v17 }
 0x96e   : > { %3954 = vmatprep.subr.bf16.mxu0 %v5074_v18 }
 0x971   : > { %3955 = vmatpush1.bf16.msra.mxu0 %v5072_v19 }
 0xa14   : > { %v4672_v20 = vpop.f32.mrf.mxu0  ;;  %v4694_v21 = vpop.f32.mrf.mxu1 }
 0xa16   : > { %v4673_v22 = vpop.f32.mrf.mxu0  ;;  %v4695_v23 = vpop.f32.mrf.mxu1 }
 0xa17   : > { %v4674_v24 = vadd.f32 %v4673_v22, %v4672_v20  ;;  %v4696_v25 = vadd.f32 %v4695_v23, %v4694_v21 }
 0xa18   : > { %v4675_v26 = vpop.f32.mrf.mxu0  ;;  %v4697_v27 = vpop.f32.mrf.mxu1 }
 0xa19   : > { %v3830_v28 = vmax.f32 %v4674_v24, %v4696_v25 }
 0xa1a   : > { %v4676_v29 = vpop.f32.mrf.mxu0  ;;  %v4698_v30 = vpop.f32.mrf.mxu1 }
 0xa1b   : > { %v3831_v31 = vpack.c.bf16 %v3830_v28, %v3830_v28 }
 0xa1d   : > { %3973 = vmatmul.mubr.bf16.vlgmr.msra.gmra.mxu0 %v3831_v31 }
 0xadd   : > { %v3974_v37 = vpop.f32.mrf.mxu0 }
 0xade   : > { %v3975_v38 = vadd.f32 %v3974_v37, %v3933_v33 }
 0xadf   : > { %v3976_v40 = vpop.f32.mrf.mxu0 }
 0xae0   : > { %v3977_v41 = vadd.f32 %v3976_v40, %v3937_v36  ;;  %v3981_v43 = vmax.f32 %v3975_v38, 0.0 }
 0xae1   : > { %v3978_v42 = vpop.f32.mrf.mxu0 }
 0xae2   : > { %v3982_v44 = vmax.f32 %v3977_v41, 0.0 }
 0xae3   : > { %v3979_v46 = vpop.f32.mrf.mxu0 }
 0xae4   : > { %v3985_v47 = vcombine.low %v3981_v43, %v3982_v44 }
 0xae6   : > { %v3992_v48 = vrot.slane %v3985_v47, %v3991_v45 }
 0xae8   : > { %v3999_v12 = vrot.slane %v3992_v48, %v3991_v45 }
 0xaea   : > { %4005 = vst.msk [vmem:[%s1005_s26] sm:$0x3] %vm4003_vm8, %v3999_v12 }
 0xaeb PF: > { %s74_s22 = sadd.s32 1, %s5081_s22  }
 0xaec   : > { %p71_p4 = scmp.ge.s32.totalorder %s74_s22, 4  }
 0xaee   :  { %73 = sbr.rel (!%p71_p4) target bundleno = 53 (0x35), region = 237 }

</bundles_post_ra>
